<compile_context>
chip_gen: v5e
topology: v5e:2x2
jax: 0.10.0
libtpu: 0.0.40
codegen_flags: <defaults>
</compile_context>

<pallas_src>
import jax
import jax.numpy as jnp
from jax.experimental import pallas as pl
from jax.experimental.pallas import tpu as pltpu

K_IN = 28 * 28          # 784  (== full last dim of x -> no lane padding needed)
HIDDEN1 = 512
HIDDEN2 = 256
NUM_CLASSES = 10
OUT_PAD = 128           # lane-dense logits block (slice [:, :10] in wrapper)
TILE_B_MAX = 1024       # upper bound on rows per grid step


def ffnn_kernel(x_ref, w1_ref, b1_ref, w2_ref, b2_ref, w3_ref, b3_ref, o_ref):
    # x arrives f32 from HBM; cast to bf16 once in VMEM for the MXU.
    x = x_ref[...].astype(jnp.bfloat16)

    # Layer 1: (tile_b, 784) @ (784, 512) -> f32 acc, + bias, ReLU.
    h1 = jnp.dot(x, w1_ref[...], preferred_element_type=jnp.float32) + b1_ref[...]
    h1 = jnp.maximum(h1, 0.0).astype(jnp.bfloat16)   # Dropout: eval-mode identity.

    # Layer 2: (tile_b, 512) @ (512, 256) -> f32 acc, + bias, ReLU.
    h2 = jnp.dot(h1, w2_ref[...], preferred_element_type=jnp.float32) + b2_ref[...]
    h2 = jnp.maximum(h2, 0.0).astype(jnp.bfloat16)   # Dropout: eval-mode identity.

    # Output layer (lane-dense, zero-padded to 128 cols): (tile_b, 256) @ (256, 128).
    out = jnp.dot(h2, w3_ref[...], preferred_element_type=jnp.float32) + b3_ref[...]
    o_ref[...] = out.astype(o_ref.dtype)


def _round_up(x, m):
    return ((x + m - 1) // m) * m


def _pick_tile_b(n, max_tile=TILE_B_MAX):
    """Adaptive batch tile: sublane-aligned, and >=2 grid steps when the batch
    is large enough (v7x shards the "parallel" axis across its 2 TCs)."""
    if n <= 16:
        return _round_up(max(n, 8), 8)          # tiny-latency path: one small tile
    half = _round_up(pl.cdiv(n, 2), 8)          # aim for a 2-step grid
    return min(max_tile, half)


def prepare_params(params):
    """One-time weight prep (hoisted out of the forward path):
    bf16 weight casts + zero-pad of the output layer to 128 lane-dense columns."""
    w1, b1, w2, b2, w3, b3 = params
    w1_b = w1.astype(jnp.bfloat16)                              # (784, 512)
    w2_b = w2.astype(jnp.bfloat16)                              # (512, 256)
    w3_p = jnp.zeros((HIDDEN2, OUT_PAD), jnp.bfloat16)
    w3_p = w3_p.at[:, :NUM_CLASSES].set(w3.astype(jnp.bfloat16))  # (256, 128)
    b1_f = b1.reshape(1, HIDDEN1).astype(jnp.float32)
    b2_f = b2.reshape(1, HIDDEN2).astype(jnp.float32)
    b3_p = jnp.zeros((1, OUT_PAD), jnp.float32)
    b3_p = b3_p.at[:, :NUM_CLASSES].set(b3.reshape(1, NUM_CLASSES).astype(jnp.float32))
    return (w1_b, b1_f, w2_b, b2_f, w3_p, b3_p)


def ffnn_forward(x, prepared):
    """x: NCHW images (..., 1, 28, 28) or anything reshapeable to (-1, 784).
    `prepared` comes from prepare_params(). Returns f32 logits (N, 10)."""
    w1_b, b1_f, w2_b, b2_f, w3_p, b3_p = prepared
    x2d = x.reshape(-1, K_IN)                    # matches x.view(-1, 784)
    if x2d.dtype not in (jnp.float32, jnp.bfloat16):
        x2d = x2d.astype(jnp.float32)
    n = x2d.shape[0]

    tile_b = _pick_tile_b(n)
    grid = (pl.cdiv(n, tile_b),)

    out_padded = pl.pallas_call(
        ffnn_kernel,
        out_shape=jax.ShapeDtypeStruct((n, OUT_PAD), jnp.float32),
        grid_spec=pltpu.PrefetchScalarGridSpec(
            num_scalar_prefetch=0,
            grid=grid,
            in_specs=[
                # Batch-tiled activations (784 == full last dim -> legal block).
                pl.BlockSpec((tile_b, K_IN), lambda i: (i, 0)),
                # Weights/biases: constant block index -> VMEM-resident across steps.
                pl.BlockSpec((K_IN, HIDDEN1), lambda i: (0, 0)),
                pl.BlockSpec((1, HIDDEN1), lambda i: (0, 0)),
                pl.BlockSpec((HIDDEN1, HIDDEN2), lambda i: (0, 0)),
                pl.BlockSpec((1, HIDDEN2), lambda i: (0, 0)),
                pl.BlockSpec((HIDDEN2, OUT_PAD), lambda i: (0, 0)),
                pl.BlockSpec((1, OUT_PAD), lambda i: (0, 0)),
            ],
            out_specs=pl.BlockSpec((tile_b, OUT_PAD), lambda i: (i, 0)),
        ),
        compiler_params=pltpu.CompilerParams(
            # Independent batch tiles -> parallel (megacore sharding on v7x).
            dimension_semantics=("parallel",),
            vmem_limit_bytes=48 * 1024 * 1024,
        ),
    )(x2d, w1_b, b1_f, w2_b, b2_f, w3_p, b3_p)

    return out_padded[:, :NUM_CLASSES]


def init_params(key):
    """Deterministic parameter init mirroring nn.Linear shapes.
    Weights are stored transposed vs. PyTorch: (in_features, out_features)."""
    ks = jax.random.split(key, 6)

    def linear(kw, kb, fan_in, fan_out):
        bound = 1.0 / jnp.sqrt(fan_in)
        w = jax.random.uniform(kw, (fan_in, fan_out), jnp.float32, -bound, bound)
        b = jax.random.uniform(kb, (1, fan_out), jnp.float32, -bound, bound)
        return w, b

    w1, b1 = linear(ks[0], ks[1], K_IN, HIDDEN1)
    w2, b2 = linear(ks[2], ks[3], HIDDEN1, HIDDEN2)
    w3, b3 = linear(ks[4], ks[5], HIDDEN2, NUM_CLASSES)
    return (w1, b1, w2, b2, w3, b3)


def ffnn_reference(x, params):
    """Pure f32 JAX reference (dropout in eval mode = identity)."""
    w1, b1, w2, b2, w3, b3 = params
    x2d = x.reshape(-1, K_IN).astype(jnp.float32)
    h1 = jnp.maximum(x2d @ w1 + b1, 0.0)
    h2 = jnp.maximum(h1 @ w2 + b2, 0.0)
    return h2 @ w3 + b3


if __name__ == "__main__":
    key = jax.random.PRNGKey(0)
    pkey, xkey = jax.random.split(key)

    params = init_params(pkey)
    prepared = prepare_params(params)   # one-time weight prep, outside forward

    # MNIST-like NCHW input: batch=2, channels=1, 28x28.
    x = jax.random.normal(xkey, (2, 1, 28, 28), dtype=jnp.float32)

    logits = ffnn_forward(x, prepared)
    jax.block_until_ready(logits)

    ref = ffnn_reference(x, params)
    assert logits.shape == (2, 10)
    # bf16 matmul inputs with f32 accumulation -> loosen tolerance vs f32 ref.
    assert jnp.allclose(logits, ref, atol=5e-2, rtol=5e-2), (
        float(jnp.max(jnp.abs(logits - ref))))

    print("KERNEL_OK")
</pallas_src>

<mosaic_0001>
module attributes {stable_mosaic.version = 11 : i64} {
  func.func @ffnn_kernel(%arg0: i32, %arg1: memref<8x784xf32, #tpu.memory_space<vmem>>, %arg2: memref<784x512xbf16, #tpu.memory_space<vmem>>, %arg3: memref<1x512xf32, #tpu.memory_space<vmem>>, %arg4: memref<512x256xbf16, #tpu.memory_space<vmem>>, %arg5: memref<1x256xf32, #tpu.memory_space<vmem>>, %arg6: memref<256x128xbf16, #tpu.memory_space<vmem>>, %arg7: memref<1x128xf32, #tpu.memory_space<vmem>>, %arg8: memref<8x128xf32, #tpu.memory_space<vmem>>) attributes {dimension_semantics = [#tpu.dimension_semantics<parallel>], iteration_bounds = array<i64: 1>, scalar_prefetch = 0 : i64, scratch_operands = 0 : i64, tpu.core_type = #tpu.core_type<tc>, window_params = [{transform_indices = @transform_0, window_bounds = array<i64: 8, 784>}, {pipeline_mode = #tpu.pipeline_mode<synchronous>, transform_indices = @transform_1, window_bounds = array<i64: 784, 512>}, {pipeline_mode = #tpu.pipeline_mode<synchronous>, transform_indices = @transform_2, window_bounds = array<i64: 1, 512>}, {pipeline_mode = #tpu.pipeline_mode<synchronous>, transform_indices = @transform_3, window_bounds = array<i64: 512, 256>}, {pipeline_mode = #tpu.pipeline_mode<synchronous>, transform_indices = @transform_4, window_bounds = array<i64: 1, 256>}, {pipeline_mode = #tpu.pipeline_mode<synchronous>, transform_indices = @transform_5, window_bounds = array<i64: 256, 128>}, {pipeline_mode = #tpu.pipeline_mode<synchronous>, transform_indices = @transform_6, window_bounds = array<i64: 1, 128>}, {transform_indices = @transform_7, window_bounds = array<i64: 8, 128>}]} {
    %c0 = arith.constant 0 : index
    %c0_0 = arith.constant 0 : index
    %0 = vector.load %arg1[%c0, %c0_0] : memref<8x784xf32, #tpu.memory_space<vmem>>, vector<8x784xf32>
    %1 = arith.truncf %0 : vector<8x784xf32> to vector<8x784xbf16>
    %c0_1 = arith.constant 0 : index
    %c0_2 = arith.constant 0 : index
    %2 = vector.load %arg2[%c0_1, %c0_2] : memref<784x512xbf16, #tpu.memory_space<vmem>>, vector<784x512xbf16>
    %cst = arith.constant dense<0.000000e+00> : vector<8x512xf32>
    %3 = tpu.matmul %1, %2, %cst {dimension_numbers = #tpu.dot_dimension_numbers<[1], [0], [0], [1], [0, 0, 1, 1], [], []>} : vector<8x784xbf16>, vector<784x512xbf16>, vector<8x512xf32> -> vector<8x512xf32>
    %c0_3 = arith.constant 0 : index
    %c0_4 = arith.constant 0 : index
    %4 = vector.load %arg3[%c0_3, %c0_4] : memref<1x512xf32, #tpu.memory_space<vmem>>, vector<1x512xf32>
    %5 = vector.broadcast %4 : vector<1x512xf32> to vector<8x512xf32>
    %6 = arith.addf %3, %5 : vector<8x512xf32>
    %cst_5 = arith.constant 0.000000e+00 : f32
    %7 = vector.broadcast %cst_5 : f32 to vector<8x512xf32>
    %8 = arith.maximumf %6, %7 : vector<8x512xf32>
    %9 = arith.truncf %8 : vector<8x512xf32> to vector<8x512xbf16>
    %c0_6 = arith.constant 0 : index
    %c0_7 = arith.constant 0 : index
    %10 = vector.load %arg4[%c0_6, %c0_7] : memref<512x256xbf16, #tpu.memory_space<vmem>>, vector<512x256xbf16>
    %cst_8 = arith.constant dense<0.000000e+00> : vector<8x256xf32>
    %11 = tpu.matmul %9, %10, %cst_8 {dimension_numbers = #tpu.dot_dimension_numbers<[1], [0], [0], [1], [0, 0, 1, 1], [], []>} : vector<8x512xbf16>, vector<512x256xbf16>, vector<8x256xf32> -> vector<8x256xf32>
    %c0_9 = arith.constant 0 : index
    %c0_10 = arith.constant 0 : index
    %12 = vector.load %arg5[%c0_9, %c0_10] : memref<1x256xf32, #tpu.memory_space<vmem>>, vector<1x256xf32>
    %13 = vector.broadcast %12 : vector<1x256xf32> to vector<8x256xf32>
    %14 = arith.addf %11, %13 : vector<8x256xf32>
    %cst_11 = arith.constant 0.000000e+00 : f32
    %15 = vector.broadcast %cst_11 : f32 to vector<8x256xf32>
    %16 = arith.maximumf %14, %15 : vector<8x256xf32>
    %17 = arith.truncf %16 : vector<8x256xf32> to vector<8x256xbf16>
    %c0_12 = arith.constant 0 : index
    %c0_13 = arith.constant 0 : index
    %18 = vector.load %arg6[%c0_12, %c0_13] : memref<256x128xbf16, #tpu.memory_space<vmem>>, vector<256x128xbf16>
    %cst_14 = arith.constant dense<0.000000e+00> : vector<8x128xf32>
    %19 = tpu.matmul %17, %18, %cst_14 {dimension_numbers = #tpu.dot_dimension_numbers<[1], [0], [0], [1], [0, 0, 1, 1], [], []>} : vector<8x256xbf16>, vector<256x128xbf16>, vector<8x128xf32> -> vector<8x128xf32>
    %c0_15 = arith.constant 0 : index
    %c0_16 = arith.constant 0 : index
    %20 = vector.load %arg7[%c0_15, %c0_16] : memref<1x128xf32, #tpu.memory_space<vmem>>, vector<1x128xf32>
    %21 = vector.broadcast %20 : vector<1x128xf32> to vector<8x128xf32>
    %22 = arith.addf %19, %21 : vector<8x128xf32>
    %c0_17 = arith.constant 0 : index
    %c0_18 = arith.constant 0 : index
    %23 = vector.load %arg8[%c0_17, %c0_18] : memref<8x128xf32, #tpu.memory_space<vmem>>, vector<8x128xf32>
    tpu.vector_store %arg8[%c0_17, %c0_18], %22 {strides = array<i32>} : memref<8x128xf32, #tpu.memory_space<vmem>>, vector<8x128xf32>,
    return
  }
  func.func @transform_0(%arg0: i32) -> (i32, i32) {
    %c0_i32 = arith.constant 0 : i32
    %c0_i32_0 = arith.constant 0 : i32
    return %arg0, %c0_i32 : i32, i32
  }
  func.func @transform_1(%arg0: i32) -> (i32, i32) {
    %c0_i32 = arith.constant 0 : i32
    %c0_i32_0 = arith.constant 0 : i32
    %c0_i32_1 = arith.constant 0 : i32
    return %c0_i32, %c0_i32_0 : i32, i32
  }
  func.func @transform_2(%arg0: i32) -> (i32, i32) {
    %c0_i32 = arith.constant 0 : i32
    %c0_i32_0 = arith.constant 0 : i32
    %c0_i32_1 = arith.constant 0 : i32
    return %c0_i32, %c0_i32_0 : i32, i32
  }
  func.func @transform_3(%arg0: i32) -> (i32, i32) {
    %c0_i32 = arith.constant 0 : i32
    %c0_i32_0 = arith.constant 0 : i32
    %c0_i32_1 = arith.constant 0 : i32
    return %c0_i32, %c0_i32_0 : i32, i32
  }
  func.func @transform_4(%arg0: i32) -> (i32, i32) {
    %c0_i32 = arith.constant 0 : i32
    %c0_i32_0 = arith.constant 0 : i32
    %c0_i32_1 = arith.constant 0 : i32
    return %c0_i32, %c0_i32_0 : i32, i32
  }
  func.func @transform_5(%arg0: i32) -> (i32, i32) {
    %c0_i32 = arith.constant 0 : i32
    %c0_i32_0 = arith.constant 0 : i32
    %c0_i32_1 = arith.constant 0 : i32
    return %c0_i32, %c0_i32_0 : i32, i32
  }
  func.func @transform_6(%arg0: i32) -> (i32, i32) {
    %c0_i32 = arith.constant 0 : i32
    %c0_i32_0 = arith.constant 0 : i32
    %c0_i32_1 = arith.constant 0 : i32
    return %c0_i32, %c0_i32_0 : i32, i32
  }
  func.func @transform_7(%arg0: i32) -> (i32, i32) {
    %c0_i32 = arith.constant 0 : i32
    %c0_i32_0 = arith.constant 0 : i32
    return %arg0, %c0_i32 : i32, i32
  }
}

</mosaic_0001>

<bundles_post_ra>
// kernel: tpu_custom_call.1
= control target key start
LH: loop header
LB: loop body
LE: loop exit
PB: predicated region body
PF: predicated region fallthrough
CT: control target
= control target key end

     0   :  { %12 = vsyncpa [#allocation3], 0  ;;  %s4097_s0 = inlined_call_operand.hbm [shape: f32[2,784], index: 0, kind: input, shape index: {}]   ;;  %s4098_s1 = inlined_call_operand.hbm [shape: bf16[784,512], index: 1, kind: input, shape index: {}]   ;;  %s4099_s2 = inlined_call_operand.hbm [shape: f32[1,512], index: 2, kind: input, shape index: {}]   ;;  %s4100_s3 = inlined_call_operand.hbm [shape: bf16[512,256], index: 3, kind: input, shape index: {}]   ;;  %s4101_s4 = inlined_call_operand.vmem [shape: f32[1,256], index: 4, kind: input, shape index: {}]   ;;  %s4102_s5 = inlined_call_operand.hbm [shape: bf16[256,128], index: 5, kind: input, shape index: {}]   ;;  %s4103_s6 = inlined_call_operand.vmem [shape: f32[1,128], index: 6, kind: input, shape index: {}]   ;;  %s4104_s7 = inlined_call_operand.hbm [shape: f32[2,128], index: 7, kind: output, shape index: {}]  }
   0x1   :  { %13 = vsyncpa [#allocation6], 0 }
   0x2   :  { %14 = vsyncpa [#allocation9], 0 }
   0x3   :  { %15 = vsyncpa [#allocation4], 0  ;;  %s33_s26 = sshll.u32 %s4098_s1, 4  ;;  %s34_s26 = int_to_ptr.hbm [resolvable:$true] %s33_s26 }
   0x4   :  { %19 = vsyncadd [#allocation3], 672  ;;  %s3949_s27 = smov [#allocation5]   ;;  %s57_s8 = sshll.u32 %s4100_s3, 4  ;;  %s58_s8 = int_to_ptr.hbm [resolvable:$true] %s57_s8 }
   0x5   :  { %s35_s28 = sshll.u32 %s3949_s27, 4  ;;  %s3950_s9 = smov 256   ;;  %s36_s28 = int_to_ptr.vmem [resolvable:$true] %s35_s28 }
   0x6   :  { %s3951_s10 = smov 16   ;;  %s3952_s11 = smov [#allocation8]  }
   0x7   :  { %41 = dma.hbm_to_vmem [thread:$0]  %s34_s26, 25088, %s36_s28, [#allocation6], %s3950_s9, %s3950_s9, %s3951_s10  }
   0x8   :  { %s59_s12 = sshll.u32 %s3952_s11, 4  ;;  %s3953_s13 = smov 128   ;;  %s60_s12 = int_to_ptr.vmem [resolvable:$true] %s59_s12 }
   0x9   :  { %s3954_s14 = smov 8   ;;  %s20_s16 = sshll.u32 %s4097_s0, 4  ;;  %s21_s16 = int_to_ptr.hbm [resolvable:$true] %s20_s16 }
   0xa   :  { %65 = dma.hbm_to_vmem [thread:$0]  %s58_s8, 8192, %s60_s12, [#allocation9], %s3953_s13, %s3953_s13, %s3954_s14  }
   0xb   :  { %s3955_s17 = smov [#allocation2]   ;;  %s47_s20 = sshll.u32 %s4099_s2, 4  ;;  %s48_s20 = int_to_ptr.hbm [resolvable:$true] %s47_s20 }
   0xc   :  { %s22_s18 = sshll.u32 %s3955_s17, 4  ;;  %s3956_s21 = smov 224   ;;  %s23_s18 = int_to_ptr.vmem [resolvable:$true] %s22_s18 }
   0xd   :  { %s3957_s22 = smov 14   ;;  %s3958_s23 = smov [#allocation7]  }
   0xe   :  { %28 = dma.hbm_to_vmem [thread:$0]  %s21_s16, 224, %s23_s18, [#allocation3], %s3956_s21, %s3956_s21, %s3957_s22  }
   0xf   :  { %s49_s24 = sshll.u32 %s3958_s23, 4  ;;  %s72_s27 = sshll.u32 %s4102_s5, 4  ;;  %s50_s24 = int_to_ptr.vmem [resolvable:$true] %s49_s24  ;;  %s73_s27 = int_to_ptr.hbm [resolvable:$true] %s72_s27 }
  0x10   :  { %52 = dma.hbm_to_vmem [thread:$0]  %s48_s20, 64, %s50_s24, [#allocation6]  }
  0x11   :  { %s3959_s0 = smov [#allocation10]   ;;  %s3960_s29 = smov 64  }
  0x12   :  { %s74_s28 = sshll.u32 %s3959_s0, 4  ;;  %s3961_s30 = smov 4   ;;  %s75_s28 = int_to_ptr.vmem [resolvable:$true] %s74_s28 }
  0x13   :  { %80 = dma.hbm_to_vmem [thread:$0]  %s73_s27, 2048, %s75_s28, [#allocation9], %s3960_s29, %s3960_s29, %s3961_s30  }
  0x14   :  { %3941 = dma.done.wait [#allocation3], 896  }
  0x15   :  { %3942 = vsyncadd [#allocation3], 4294966400 }
  0x16   :  { %3943 = dma.done.wait [#allocation6], 25152  }
  0x17   :  { %3944 = vsyncadd [#allocation6], 4294942144 }
  0x18   :  { %3945 = dma.done.wait [#allocation9], 10240  }
  0x19   :  { %3946 = vsyncadd [#allocation9], 4294957056  ;;  %v2510_v0 = vld [vmem:[#allocation5 + $0xe0] sm:$0xf]  ;;  %v3534_v1 = vld [vmem:[#allocation5 + $0xec] sm:$0xf0] }
  0x1a   :  { %v2638_v2 = vld [vmem:[#allocation5 + $0x1e0] sm:$0xf]  ;;  %v2511_v3 = vor.u32 %v3534_v1, %v2510_v0  ;;  %v3566_v4 = vld [vmem:[#allocation5 + $0x1ec] sm:$0xf0]  ;;  %vm1342_vm0 = vcmask 130048  }
  0x1b   :  { %v2766_v5 = vld [vmem:[#allocation5 + $0x2e0] sm:$0xf]  ;;  %v3598_v6 = vld [vmem:[#allocation5 + $0x2ec] sm:$0xf0]  ;;  %v2639_v7 = vor.u32 %v3566_v4, %v2638_v2 }
  0x1c   :  { %v2767_v8 = vor.u32 %v3598_v6, %v2766_v5  ;;  %v2894_v9 = vld [vmem:[#allocation5 + $0x3e0] sm:$0xf]  ;;  %v3630_v10 = vld [vmem:[#allocation5 + $0x3ec] sm:$0xf0]  ;;  %1346 = vmatpush.bf16.msra.mxu0 %v2511_v3 }
  0x1d   :  { %v2494_v11 = vld [vmem:[#allocation5 + $0xc0] sm:$0xf]  ;;  %v2895_v12 = vor.u32 %v3630_v10, %v2894_v9  ;;  %v3530_v13 = vld [vmem:[#allocation5 + $0xcc] sm:$0xf0]  ;;  %1359 = vmatpush.bf16.msra.mxu1 %v2639_v7 }
  0x1e   :  { %v2622_v14 = vld [vmem:[#allocation5 + $0x1c0] sm:$0xf]  ;;  %v3562_v15 = vld [vmem:[#allocation5 + $0x1cc] sm:$0xf0]  ;;  %1372 = vmatpush.bf16.msra.mxu2 %v2767_v8  ;;  %v2495_v16 = vor.u32 %v3530_v13, %v2494_v11 }
  0x1f   :  { %v2623_v17 = vor.u32 %v3562_v15, %v2622_v14  ;;  %v2750_v18 = vld [vmem:[#allocation5 + $0x2c0] sm:$0xf]  ;;  %v3594_v19 = vld [vmem:[#allocation5 + $0x2cc] sm:$0xf0]  ;;  %1385 = vmatpush.bf16.msra.mxu3 %v2895_v12 }
  0x20   :  { %v2878_v20 = vld [vmem:[#allocation5 + $0x3c0] sm:$0xf]  ;;  %v2751_v21 = vor.u32 %v3594_v19, %v2750_v18  ;;  %v3626_v22 = vld [vmem:[#allocation5 + $0x3cc] sm:$0xf0]  ;;  %1347 = vmatpush.bf16.msra.mxu0 %v2495_v16 }
  0x21   :  { %v2478_v23 = vld [vmem:[#allocation5 + $0xa0] sm:$0xf]  ;;  %v3526_v24 = vld [vmem:[#allocation5 + $0xac] sm:$0xf0]  ;;  %v2879_v25 = vor.u32 %v3626_v22, %v2878_v20  ;;  %1360 = vmatpush.bf16.msra.mxu1 %v2623_v17 }
  0x22   :  { %v2606_v26 = vld [vmem:[#allocation5 + $0x1a0] sm:$0xf]  ;;  %v3558_v27 = vld [vmem:[#allocation5 + $0x1ac] sm:$0xf0]  ;;  %v2479_v29 = vor.u32 %v3526_v24, %v2478_v23  ;;  %1373 = vmatpush.bf16.msra.mxu2 %v2751_v21  ;;  %v104_v23 = vld [vmem:[#allocation2] sm:$0xff] }
  0x23   :  { %v2734_v28 = vld [vmem:[#allocation5 + $0x2a0] sm:$0xf]  ;;  %v3590_v30 = vld [vmem:[#allocation5 + $0x2ac] sm:$0xf0]  ;;  %v2607_v33 = vor.u32 %v3558_v27, %v2606_v26  ;;  %1386 = vmatpush.bf16.msra.mxu3 %v2879_v25  ;;  %v106_v24 = vld [vmem:[#allocation2 + $0xe] sm:$0xff] }
  0x24   :  { %v2862_v31 = vld [vmem:[#allocation5 + $0x3a0] sm:$0xf]  ;;  %v3622_v32 = vld [vmem:[#allocation5 + $0x3ac] sm:$0xf0]  ;;  %v2735_v34 = vor.u32 %v3590_v30, %v2734_v28  ;;  %1348 = vmatpush.bf16.msra.mxu0 %v2479_v29  ;;  %v108_v29 = vld [vmem:[#allocation2 + $0x1c] sm:$0xff] }
  0x25   :  { %v2462_v35 = vld [vmem:[#allocation5 + $0x80] sm:$0xf]  ;;  %v3522_v36 = vld [vmem:[#allocation5 + $0x8c] sm:$0xf0]  ;;  %v2863_v38 = vor.u32 %v3622_v32, %v2862_v31  ;;  %1361 = vmatpush.bf16.msra.mxu1 %v2607_v33  ;;  %120 = vst [vmem:[#allocation1] ss:$4 sm:$0xff] %v104_v23 }
  0x26   :  { %v2590_v37 = vld [vmem:[#allocation5 + $0x180] sm:$0xf]  ;;  %v3554_v39 = vld [vmem:[#allocation5 + $0x18c] sm:$0xf0]  ;;  %v2463_v44 = vor.u32 %v3522_v36, %v2462_v35  ;;  %1374 = vmatpush.bf16.msra.mxu2 %v2735_v34  ;;  %122 = vst [vmem:[#allocation1 + $0x1] ss:$4 sm:$0xff] %v106_v24 }
  0x27   :  { %v2718_v40 = vld [vmem:[#allocation5 + $0x280] sm:$0xf]  ;;  %v3586_v41 = vld [vmem:[#allocation5 + $0x28c] sm:$0xf0]  ;;  %v2591_v45 = vor.u32 %v3554_v39, %v2590_v37  ;;  %1387 = vmatpush.bf16.msra.mxu3 %v2863_v38  ;;  %124 = vst [vmem:[#allocation1 + $0x2] ss:$4 sm:$0xff] %v108_v29 }
  0x28   :  { %v2846_v42 = vld [vmem:[#allocation5 + $0x380] sm:$0xf]  ;;  %v3618_v43 = vld [vmem:[#allocation5 + $0x38c] sm:$0xf0]  ;;  %v2719_v46 = vor.u32 %v3586_v41, %v2718_v40  ;;  %1349 = vmatpush.bf16.msra.mxu0 %v2463_v44  ;;  %v3532_v37 = vld [vmem:[#allocation5 + $0xe4] sm:$0xf] }
  0x29   :  { %v2446_v47 = vld [vmem:[#allocation5 + $0x60] sm:$0xf]  ;;  %v3518_v48 = vld [vmem:[#allocation5 + $0x6c] sm:$0xf0]  ;;  %v2847_v50 = vor.u32 %v3618_v43, %v2846_v42  ;;  %1362 = vmatpush.bf16.msra.mxu1 %v2591_v45  ;;  %v2512_v38 = vld [vmem:[#allocation5 + $0xf0] sm:$0xf0] }
  0x2a   :  { %v2574_v49 = vld [vmem:[#allocation5 + $0x160] sm:$0xf]  ;;  %v3550_v51 = vld [vmem:[#allocation5 + $0x16c] sm:$0xf0]  ;;  %v2447_v56 = vor.u32 %v3518_v48, %v2446_v47  ;;  %1375 = vmatpush.bf16.msra.mxu2 %v2719_v46  ;;  %v2515_v46 = vor.u32 %v3532_v37, %v2512_v38  ;;  %v3564_v47 = vld [vmem:[#allocation5 + $0x1e4] sm:$0xf] }
  0x2b   :  { %v2702_v52 = vld [vmem:[#allocation5 + $0x260] sm:$0xf]  ;;  %v3582_v53 = vld [vmem:[#allocation5 + $0x26c] sm:$0xf0]  ;;  %v2575_v57 = vor.u32 %v3550_v51, %v2574_v49  ;;  %1388 = vmatpush.bf16.msra.mxu3 %v2847_v50  ;;  %v2640_v51 = vld [vmem:[#allocation5 + $0x1f0] sm:$0xf0] }
  0x2c   :  { %v2830_v54 = vld [vmem:[#allocation5 + $0x360] sm:$0xf]  ;;  %v3614_v55 = vld [vmem:[#allocation5 + $0x36c] sm:$0xf0]  ;;  %v2703_v58 = vor.u32 %v3582_v53, %v2702_v52  ;;  %1350 = vmatpush.bf16.msra.mxu0 %v2447_v56  ;;  %v2464_v23 = vld [vmem:[#allocation5 + $0x90] sm:$0xf0] }
  0x2d   :  { %v2430_v59 = vld [vmem:[#allocation5 + $0x40] sm:$0xf]  ;;  %v3514_v60 = vld [vmem:[#allocation5 + $0x4c] sm:$0xf0]  ;;  %v2831_v62 = vor.u32 %v3614_v55, %v2830_v54  ;;  %1363 = vmatpush.bf16.msra.mxu1 %v2575_v57  ;;  %v3528_v54 = vld [vmem:[#allocation5 + $0xc4] sm:$0xf] }
  0x2e   :  { %v2558_v61 = vld [vmem:[#allocation5 + $0x140] sm:$0xf]  ;;  %v3546_v63 = vld [vmem:[#allocation5 + $0x14c] sm:$0xf0]  ;;  %v2431_v4 = vor.u32 %v3514_v60, %v2430_v59  ;;  %1376 = vmatpush.bf16.msra.mxu2 %v2703_v58  ;;  %v2496_v55 = vld [vmem:[#allocation5 + $0xd0] sm:$0xf0] }
  0x2f   :  { %v2686_v0 = vld [vmem:[#allocation5 + $0x240] sm:$0xf]  ;;  %v3578_v1 = vld [vmem:[#allocation5 + $0x24c] sm:$0xf0]  ;;  %v2559_v6 = vor.u32 %v3546_v63, %v2558_v61  ;;  %1389 = vmatpush.bf16.msra.mxu3 %v2831_v62  ;;  %v3560_v58 = vld [vmem:[#allocation5 + $0x1c4] sm:$0xf] }
  0x30   :  { %v2814_v2 = vld [vmem:[#allocation5 + $0x340] sm:$0xf]  ;;  %v3610_v3 = vld [vmem:[#allocation5 + $0x34c] sm:$0xf0]  ;;  %v2687_v7 = vor.u32 %v3578_v1, %v2686_v0  ;;  %1351 = vmatpush.bf16.msra.mxu0 %v2431_v4  ;;  %v2624_v59 = vld [vmem:[#allocation5 + $0x1d0] sm:$0xf0]  ;;  %v2643_v0 = vor.u32 %v3564_v47, %v2640_v51  ;;  %v2499_v4 = vor.u32 %v3528_v54, %v2496_v55 }
  0x31   :  { %v2414_v5 = vld [vmem:[#allocation5 + $0x20] sm:$0xf]  ;;  %v3510_v8 = vld [vmem:[#allocation5 + $0x2c] sm:$0xf0]  ;;  %v2815_v11 = vor.u32 %v3610_v3, %v2814_v2  ;;  %1364 = vmatpush.bf16.msra.mxu1 %v2559_v6  ;;  %v2432_v51 = vld [vmem:[#allocation5 + $0x50] sm:$0xf0] }
  0x32   :  { %v2542_v9 = vld [vmem:[#allocation5 + $0x120] sm:$0xf]  ;;  %v3542_v10 = vld [vmem:[#allocation5 + $0x12c] sm:$0xf0]  ;;  %v2415_v18 = vor.u32 %v3510_v8, %v2414_v5  ;;  %1377 = vmatpush.bf16.msra.mxu2 %v2687_v7  ;;  %v3544_v55 = vld [vmem:[#allocation5 + $0x144] sm:$0xf] }
  0x33   :  { %v2670_v12 = vld [vmem:[#allocation5 + $0x220] sm:$0xf]  ;;  %v3574_v13 = vld [vmem:[#allocation5 + $0x22c] sm:$0xf0]  ;;  %v2543_v25 = vor.u32 %v3542_v10, %v2542_v9  ;;  %1390 = vmatpush.bf16.msra.mxu3 %v2815_v11  ;;  %v3524_v10 = vld [vmem:[#allocation5 + $0xa4] sm:$0xf] }
  0x34   :  { %v2798_v14 = vld [vmem:[#allocation5 + $0x320] sm:$0xf]  ;;  %v3606_v15 = vld [vmem:[#allocation5 + $0x32c] sm:$0xf0]  ;;  %v2671_v26 = vor.u32 %v3574_v13, %v2670_v12  ;;  %1352 = vmatpush.bf16.msra.mxu0 %v2415_v18  ;;  %v2480_v11 = vld [vmem:[#allocation5 + $0xb0] sm:$0xf0]  ;;  %v2627_v13 = vor.u32 %v3560_v58, %v2624_v59 }
  0x35   :  { %v2398_v16 = vld [vmem:[#allocation5] sm:$0xf]  ;;  %v3506_v17 = vld [vmem:[#allocation5 + $0xc] sm:$0xf0]  ;;  %v2799_v31 = vor.u32 %v3606_v15, %v2798_v14  ;;  %1365 = vmatpush.bf16.msra.mxu1 %v2543_v25  ;;  %v3556_v15 = vld [vmem:[#allocation5 + $0x1a4] sm:$0xf]  ;;  %v2483_v18 = vor.u32 %v3524_v10, %v2480_v11 }
  0x36   :  { %v2526_v19 = vld [vmem:[#allocation5 + $0x100] sm:$0xf]  ;;  %v3538_v20 = vld [vmem:[#allocation5 + $0x10c] sm:$0xf0]  ;;  %v2399_v36 = vor.u32 %v3506_v17, %v2398_v16  ;;  %1378 = vmatpush.bf16.msra.mxu2 %v2671_v26  ;;  %v3552_v25 = vld [vmem:[#allocation5 + $0x184] sm:$0xf] }
  0x37   :  { %v2654_v21 = vld [vmem:[#allocation5 + $0x200] sm:$0xf]  ;;  %v3570_v22 = vld [vmem:[#allocation5 + $0x20c] sm:$0xf0]  ;;  %v2527_v39 = vor.u32 %v3538_v20, %v2526_v19  ;;  %1391 = vmatpush.bf16.msra.mxu3 %v2799_v31  ;;  %v2608_v19 = vld [vmem:[#allocation5 + $0x1b0] sm:$0xf0] }
  0x38   :  { %v2782_v27 = vld [vmem:[#allocation5 + $0x300] sm:$0xf]  ;;  %v3602_v28 = vld [vmem:[#allocation5 + $0x30c] sm:$0xf0]  ;;  %v2655_v40 = vor.u32 %v3570_v22, %v2654_v21  ;;  %1353 = vmatpush.bf16.msra.mxu0 %v2399_v36  ;;  %v3520_v22 = vld [vmem:[#allocation5 + $0x84] sm:$0xf] }
  0x39   :  { %v110_v30 = vld [vmem:[#allocation2 + $0x2a] sm:$0xff]  ;;  %v3022_v32 = vld [vmem:[#allocation5 + $0x4e0] sm:$0xf]  ;;  %v2783_v43 = vor.u32 %v3602_v28, %v2782_v27  ;;  %1366 = vmatpush.bf16.msra.mxu1 %v2527_v39  ;;  %v2611_v27 = vor.u32 %v3556_v15, %v2608_v19  ;;  %v109_v38 = vld [vmem:[#allocation2 + $0x24] sm:$0x3f] }
  0x3a   :  { %v3662_v33 = vld [vmem:[#allocation5 + $0x4ec] sm:$0xf0]  ;;  %v3150_v34 = vld [vmem:[#allocation5 + $0x5e0] sm:$0xf]  ;;  %126 = vst [vmem:[#allocation1 + $0x3] ss:$4 sm:$0xff] %v110_v30  ;;  %1379 = vmatpush.bf16.msra.mxu2 %v2655_v40 }
  0x3b   :  { %v3694_v35 = vld [vmem:[#allocation5 + $0x5ec] sm:$0xf0]  ;;  %v3166_v41 = vld [vmem:[#allocation5 + $0x600] sm:$0xf]  ;;  %v3023_v44 = vor.u32 %v3662_v33, %v3022_v32  ;;  %1392 = vmatpush.bf16.msra.mxu3 %v2783_v43  ;;  %v2592_v26 = vld [vmem:[#allocation5 + $0x190] sm:$0xf0]  ;;  %v2467_v32 = vor.u32 %v3520_v22, %v2464_v23 }
  0x3c   :  { %v3698_v42 = vld [vmem:[#allocation5 + $0x60c] sm:$0xf0]  ;;  %v3151_v45 = vor.u32 %v3694_v35, %v3150_v34  ;;  %v3006_v48 = vld [vmem:[#allocation5 + $0x4c0] sm:$0xf]  ;;  %v3516_v34 = vld [vmem:[#allocation5 + $0x64] sm:$0xf]  ;;  %v2595_v43 = vor.u32 %v3552_v25, %v2592_v26 }
  0x3d   :  { %v3658_v49 = vld [vmem:[#allocation5 + $0x4cc] sm:$0xf0]  ;;  %v3167_v50 = vor.u32 %v3698_v42, %v3166_v41  ;;  %v3134_v52 = vld [vmem:[#allocation5 + $0x5c0] sm:$0xf]  ;;  %1398 = vmatpush.bf16.msrb.mxu0 %v3023_v44  ;;  %v2448_v36 = vld [vmem:[#allocation5 + $0x70] sm:$0xf0] }
  0x3e   :  { %v3690_v53 = vld [vmem:[#allocation5 + $0x5cc] sm:$0xf0]  ;;  %v2990_v56 = vld [vmem:[#allocation5 + $0x4a0] sm:$0xf]  ;;  %v3007_v57 = vor.u32 %v3658_v49, %v3006_v48  ;;  %1411 = vmatpush.bf16.msrb.mxu1 %v3151_v45  ;;  %v3548_v40 = vld [vmem:[#allocation5 + $0x164] sm:$0xf]  ;;  %v2451_v47 = vor.u32 %v3516_v34, %v2448_v36 }
  0x3f   :  { %v3654_v60 = vld [vmem:[#allocation5 + $0x4ac] sm:$0xf0]  ;;  %v3118_v61 = vld [vmem:[#allocation5 + $0x5a0] sm:$0xf]  ;;  %1437 = vmatpush.bf16.msrb.mxu3 %v2515_v46  ;;  %v3135_v1 = vor.u32 %v3690_v53, %v3134_v52  ;;  %1431 = vmatpush.bf16.msrb.mxu2 %v3167_v50  ;;  %v2576_v41 = vld [vmem:[#allocation5 + $0x170] sm:$0xf0] }
  0x40   :  { %v3686_v62 = vld [vmem:[#allocation5 + $0x5ac] sm:$0xf0]  ;;  %v2991_v12 = vor.u32 %v3654_v60, %v2990_v56  ;;  %v2974_v16 = vld [vmem:[#allocation5 + $0x480] sm:$0xf]  ;;  %v111_v42 = vld [vmem:[#allocation2 + $0x32] sm:$0x3f]  ;;  %v2579_v53 = vor.u32 %v3548_v40, %v2576_v41 }
  0x41   :  { %v137_v63 = vld.sshfl [vmem:[#allocation1 + $0x10] sm:$0xff pattern:$0x73625140]  ;;  %v135_v2 = vld.sshfl [vmem:[#allocation1] sm:$0xff pattern:$0x73625140]  ;;  %1399 = vmatpush.bf16.msrb.mxu0 %v3007_v57  ;;  %v3119_v14 = vor.u32 %v3686_v62, %v3118_v61 }
  0x42   :  { %v4020_v3 = vpack.c.bf16 %v137_v63, %v137_v63  ;;  %v4022_v5 = vpack.c.bf16 %v135_v2, %v135_v2  ;;  %v138_v6 = vld.sshfl [vmem:[#allocation1 + $0x18] sm:$0xff pattern:$0x73625140]  ;;  %v136_v7 = vld.sshfl [vmem:[#allocation1 + $0x8] sm:$0xff pattern:$0x73625140]  ;;  %1412 = vmatpush.bf16.msrb.mxu1 %v3135_v1 }
  0x43   :  { %v4024_v8 = vpack.c.bf16 %v138_v6, %v138_v6  ;;  %v4026_v9 = vpack.c.bf16 %v136_v7, %v136_v7  ;;  %v3650_v17 = vld [vmem:[#allocation5 + $0x48c] sm:$0xf0]  ;;  %1438 = vmatpush.bf16.msrb.mxu3 %v2499_v4  ;;  %v3102_v20 = vld [vmem:[#allocation5 + $0x580] sm:$0xf]  ;;  %132 = vst [vmem:[#allocation1 + $0x22] ss:$4 sm:$0xff] %v109_v38 }
  0x44   :  { %1380 = vmatmul.bf16.vlgmr.msra.gmra.mxu2 %v4020_v3  ;;  %1354 = vmatmul.bf16.vlgmr.msra.gmra.mxu0 %v4022_v5  ;;  %v3682_v21 = vld [vmem:[#allocation5 + $0x58c] sm:$0xf0]  ;;  %v2975_v24 = vor.u32 %v3650_v17, %v2974_v16  ;;  %v2958_v29 = vld [vmem:[#allocation5 + $0x460] sm:$0xf]  ;;  %v3512_v50 = vld [vmem:[#allocation5 + $0x44] sm:$0xf] }
  0x45   :  { %1450 = vmatpush.bf16.msra.mxu2 %v2643_v0  ;;  %1393 = vmatmul.bf16.vlgmr.msra.gmra.mxu3 %v4024_v8  ;;  %v3103_v28 = vor.u32 %v3682_v21, %v3102_v20  ;;  %v3646_v30 = vld [vmem:[#allocation5 + $0x46c] sm:$0xf0]  ;;  %v3086_v31 = vld [vmem:[#allocation5 + $0x560] sm:$0xf]  ;;  %134 = vst [vmem:[#allocation1 + $0x23] ss:$4 sm:$0xff] %v111_v42  ;;  %v2435_v58 = vor.u32 %v3512_v50, %v2432_v51 }
  0x46   :  { %1367 = vmatmul.bf16.vlgmr.msra.gmra.mxu1 %v4026_v9  ;;  %1400 = vmatpush.bf16.msrb.mxu0 %v2991_v12  ;;  %v3678_v33 = vld [vmem:[#allocation5 + $0x56c] sm:$0xf0]  ;;  %v107_v37 = vld [vmem:[#allocation2 + $0x16] sm:$0x3f]  ;;  %v2959_v39 = vor.u32 %v3646_v30, %v2958_v29  ;;  %v2560_v59 = vld [vmem:[#allocation5 + $0x150] sm:$0xf0] }
  0x47   :  { %1413 = vmatpush.bf16.msrb.mxu1 %v3119_v14  ;;  %1439 = vmatpush.bf16.msrb.mxu3 %v2483_v18  ;;  %v105_v35 = vld [vmem:[#allocation2 + $0x8] sm:$0x3f]  ;;  %v3087_v44 = vor.u32 %v3678_v33, %v3086_v31  ;;  %v2942_v45 = vld [vmem:[#allocation5 + $0x440] sm:$0xf]  ;;  %130 = vst [vmem:[#allocation1 + $0x21] ss:$4 sm:$0xff] %v107_v37  ;;  %v2563_v10 = vor.u32 %v3544_v55, %v2560_v59 }
  0x48   :  { %128 = vst [vmem:[#allocation1 + $0x20] ss:$4 sm:$0xff] %v105_v35  ;;  %v3642_v46 = vld [vmem:[#allocation5 + $0x44c] sm:$0xf0]  ;;  %v3070_v48 = vld [vmem:[#allocation5 + $0x540] sm:$0xf] }
  0x49   :  { %1451 = vmatpush.bf16.msra.mxu2 %v2627_v13  ;;  %v3674_v49 = vld [vmem:[#allocation5 + $0x54c] sm:$0xf0]  ;;  %v2943_v52 = vor.u32 %v3642_v46, %v2942_v45  ;;  %v2926_v56 = vld [vmem:[#allocation5 + $0x420] sm:$0xf]  ;;  %v3508_v62 = vld [vmem:[#allocation5 + $0x24] sm:$0xf] }
  0x4a   :  { %1401 = vmatpush.bf16.msrb.mxu0 %v2975_v24  ;;  %v3071_v54 = vor.u32 %v3674_v49, %v3070_v48  ;;  %v3638_v57 = vld [vmem:[#allocation5 + $0x42c] sm:$0xf0]  ;;  %v3054_v60 = vld [vmem:[#allocation5 + $0x520] sm:$0xf]  ;;  %v2416_v63 = vld [vmem:[#allocation5 + $0x30] sm:$0xf0] }
  0x4b   :  { %1414 = vmatpush.bf16.msrb.mxu1 %v3103_v28  ;;  %1440 = vmatpush.bf16.msrb.mxu3 %v2467_v32  ;;  %v3670_v61 = vld [vmem:[#allocation5 + $0x52c] sm:$0xf0]  ;;  %v2927_v0 = vor.u32 %v3638_v57, %v2926_v56  ;;  %v3540_v1 = vld [vmem:[#allocation5 + $0x124] sm:$0xf]  ;;  %v2544_v2 = vld [vmem:[#allocation5 + $0x130] sm:$0xf0]  ;;  %v2419_v16 = vor.u32 %v3508_v62, %v2416_v63 }
  0x4c   :  { %v2910_v4 = vld [vmem:[#allocation5 + $0x400] sm:$0xf]  ;;  %v3634_v6 = vld [vmem:[#allocation5 + $0x40c] sm:$0xf0]  ;;  %v3055_v11 = vor.u32 %v3670_v61, %v3054_v60  ;;  %v3504_v13 = vld [vmem:[#allocation5 + $0x4] sm:$0xf]  ;;  %v2547_v26 = vor.u32 %v3540_v1, %v2544_v2 }
  0x4d   :  { %1452 = vmatpush.bf16.msra.mxu2 %v2611_v27  ;;  %v3038_v7 = vld [vmem:[#allocation5 + $0x500] sm:$0xf]  ;;  %v3666_v12 = vld [vmem:[#allocation5 + $0x50c] sm:$0xf0]  ;;  %v2400_v14 = vld [vmem:[#allocation5 + $0x10] sm:$0xf0]  ;;  %v2911_v22 = vor.u32 %v3634_v6, %v2910_v4 }
  0x4e   :  { %1402 = vmatpush.bf16.msrb.mxu0 %v2959_v39  ;;  %v3596_v17 = vld [vmem:[#allocation5 + $0x2e4] sm:$0xf]  ;;  %v2768_v19 = vld [vmem:[#allocation5 + $0x2f0] sm:$0xf0]  ;;  %v3039_v27 = vor.u32 %v3666_v12, %v3038_v7  ;;  %v2403_v30 = vor.u32 %v3504_v13, %v2400_v14 }
  0x4f   :  { %1415 = vmatpush.bf16.msrb.mxu1 %v3087_v44  ;;  %1441 = vmatpush.bf16.msrb.mxu3 %v2451_v47  ;;  %v141_v15 = vld.sshfl [vmem:[#allocation1 + $0x30] sm:$0xff pattern:$0x73625140]  ;;  %v3628_v20 = vld [vmem:[#allocation5 + $0x3e4] sm:$0xf]  ;;  %v2771_v31 = vor.u32 %v3596_v17, %v2768_v19 }
  0x50   :  { %v4032_v18 = vpack.c.bf16 %v141_v15, %v141_v15  ;;  %v2896_v21 = vld [vmem:[#allocation5 + $0x3f0] sm:$0xf0]  ;;  %v3660_v23 = vld [vmem:[#allocation5 + $0x4e4] sm:$0xf] }
  0x51   :  { %1453 = vmatpush.bf16.msra.mxu2 %v2595_v43  ;;  %v3024_v24 = vld [vmem:[#allocation5 + $0x4f0] sm:$0xf0]  ;;  %v3536_v25 = vld [vmem:[#allocation5 + $0x104] sm:$0xf]  ;;  %v2899_v35 = vor.u32 %v3628_v20, %v2896_v21 }
  0x52   :  { %1403 = vmatpush.bf16.msrb.mxu0 %v2943_v52  ;;  %v139_v28 = vld.sshfl [vmem:[#allocation1 + $0x20] sm:$0xff pattern:$0x73625140]  ;;  %v140_v29 = vld.sshfl [vmem:[#allocation1 + $0x28] sm:$0xff pattern:$0x73625140]  ;;  %v3027_v36 = vor.u32 %v3660_v23, %v3024_v24 }
  0x53   :  { %1416 = vmatpush.bf16.msrb.mxu1 %v3071_v54  ;;  %1442 = vmatpush.bf16.msrb.mxu3 %v2435_v58  ;;  %v2528_v32 = vld [vmem:[#allocation5 + $0x110] sm:$0xf0]  ;;  %v3692_v33 = vld [vmem:[#allocation5 + $0x5e4] sm:$0xf]  ;;  %v4036_v40 = vpack.c.bf16 %v139_v28, %v139_v28  ;;  %v4038_v41 = vpack.c.bf16 %v140_v29, %v140_v29 }
  0x54   :  { %3180 = vmatmul.msk.bf16.vlgmr.msrb.gmra.mxu2 %vm1342_vm0, %v4032_v18  ;;  %v3152_v34 = vld [vmem:[#allocation5 + $0x5f0] sm:$0xf0]  ;;  %v3592_v37 = vld [vmem:[#allocation5 + $0x2c4] sm:$0xf]  ;;  %v2531_v45 = vor.u32 %v3536_v25, %v2528_v32 }
  0x55   :  { %1454 = vmatpush.bf16.msra.mxu2 %v2579_v53  ;;  %v2752_v38 = vld [vmem:[#allocation5 + $0x2d0] sm:$0xf0]  ;;  %v3624_v39 = vld [vmem:[#allocation5 + $0x3c4] sm:$0xf]  ;;  %v3155_v46 = vor.u32 %v3692_v33, %v3152_v34 }
  0x56   :  { %1404 = vmatpush.bf16.msrb.mxu0 %v2927_v0  ;;  %v2880_v42 = vld [vmem:[#allocation5 + $0x3d0] sm:$0xf0]  ;;  %v3656_v43 = vld [vmem:[#allocation5 + $0x4c4] sm:$0xf]  ;;  %v2755_v47 = vor.u32 %v3592_v37, %v2752_v38 }
  0x57   :  { %1417 = vmatpush.bf16.msrb.mxu1 %v3055_v11  ;;  %1443 = vmatpush.bf16.msrb.mxu3 %v2419_v16  ;;  %v3008_v44 = vld [vmem:[#allocation5 + $0x4d0] sm:$0xf0]  ;;  %v3688_v48 = vld [vmem:[#allocation5 + $0x5c4] sm:$0xf]  ;;  %v2883_v50 = vor.u32 %v3624_v39, %v2880_v42 }
  0x58   :  { %v3136_v49 = vld [vmem:[#allocation5 + $0x5d0] sm:$0xf0]  ;;  %v3011_v51 = vor.u32 %v3656_v43, %v3008_v44  ;;  %v3588_v52 = vld [vmem:[#allocation5 + $0x2a4] sm:$0xf] }
  0x59   :  { %1455 = vmatpush.bf16.msra.mxu2 %v2563_v10  ;;  %v2736_v53 = vld [vmem:[#allocation5 + $0x2b0] sm:$0xf0]  ;;  %v3620_v54 = vld [vmem:[#allocation5 + $0x3a4] sm:$0xf]  ;;  %v3139_v58 = vor.u32 %v3688_v48, %v3136_v49 }
  0x5a   :  { %1405 = vmatpush.bf16.msrb.mxu0 %v2911_v22  ;;  %v2864_v55 = vld [vmem:[#allocation5 + $0x3b0] sm:$0xf0]  ;;  %v3652_v56 = vld [vmem:[#allocation5 + $0x4a4] sm:$0xf]  ;;  %v2739_v59 = vor.u32 %v3588_v52, %v2736_v53 }
  0x5b   :  { %1418 = vmatpush.bf16.msrb.mxu1 %v3039_v27  ;;  %1444 = vmatpush.bf16.msrb.mxu3 %v2403_v30  ;;  %v2992_v57 = vld [vmem:[#allocation5 + $0x4b0] sm:$0xf0]  ;;  %v3684_v60 = vld [vmem:[#allocation5 + $0x5a4] sm:$0xf]  ;;  %v2867_v62 = vor.u32 %v3620_v54, %v2864_v55 }
  0x5c   :  { %v3120_v61 = vld [vmem:[#allocation5 + $0x5b0] sm:$0xf0]  ;;  %v2995_v63 = vor.u32 %v3652_v56, %v2992_v57  ;;  %v3584_v0 = vld [vmem:[#allocation5 + $0x284] sm:$0xf] }
  0x5d   :  { %1456 = vmatpush.bf16.msra.mxu2 %v2547_v26  ;;  %1406 = vmatmul.bf16.vlgmr.msrb.gmra.mxu0 %v4036_v40  ;;  %v2720_v1 = vld [vmem:[#allocation5 + $0x290] sm:$0xf0]  ;;  %v3616_v2 = vld [vmem:[#allocation5 + $0x384] sm:$0xf]  ;;  %v3123_v10 = vor.u32 %v3684_v60, %v3120_v61  ;;  %v2518_v61 = vld [vmem:[#allocation5 + $0xe8] sm:$0xf] }
  0x5e   :  { %1463 = vmatpush.bf16.msra.mxu0 %v2771_v31  ;;  %1419 = vmatmul.bf16.vlgmr.msrb.gmra.mxu1 %v4038_v41  ;;  %v2848_v4 = vld [vmem:[#allocation5 + $0x390] sm:$0xf0]  ;;  %v3648_v6 = vld [vmem:[#allocation5 + $0x484] sm:$0xf]  ;;  %v2723_v11 = vor.u32 %v3584_v0, %v2720_v1  ;;  %v3567_v0 = vld [vmem:[#allocation5 + $0x1f4] sm:$0xf0] }
  0x5f   :  { %1476 = vmatpush.bf16.msra.mxu1 %v2899_v35  ;;  %1489 = vmatpush.bf16.msra.mxu3 %v3027_v36  ;;  %v2976_v7 = vld [vmem:[#allocation5 + $0x490] sm:$0xf0]  ;;  %v3680_v12 = vld [vmem:[#allocation5 + $0x584] sm:$0xf]  ;;  %v2851_v14 = vor.u32 %v3616_v2, %v2848_v4 }
  0x60   :  { %1445 = vmatmul.bf16.vlgmr.msrb.gmra.mxu3 %v4022_v5  ;;  %v3104_v13 = vld [vmem:[#allocation5 + $0x590] sm:$0xf0]  ;;  %v2979_v15 = vor.u32 %v3648_v6, %v2976_v7  ;;  %v3580_v16 = vld [vmem:[#allocation5 + $0x264] sm:$0xf] }
  0x61   :  { %1457 = vmatpush.bf16.msra.mxu2 %v2531_v45  ;;  %v2704_v17 = vld [vmem:[#allocation5 + $0x270] sm:$0xf0]  ;;  %v3612_v19 = vld [vmem:[#allocation5 + $0x364] sm:$0xf]  ;;  %v3107_v23 = vor.u32 %v3680_v12, %v3104_v13 }
  0x62   :  { %1464 = vmatpush.bf16.msra.mxu0 %v2755_v47  ;;  %v2832_v20 = vld [vmem:[#allocation5 + $0x370] sm:$0xf0]  ;;  %v3644_v21 = vld [vmem:[#allocation5 + $0x464] sm:$0xf]  ;;  %v2707_v24 = vor.u32 %v3580_v16, %v2704_v17  ;;  %v3631_v16 = vld [vmem:[#allocation5 + $0x3f4] sm:$0xf0] }
  0x63   :  { %1477 = vmatpush.bf16.msra.mxu1 %v2883_v50  ;;  %1490 = vmatpush.bf16.msra.mxu3 %v3011_v51  ;;  %v2960_v22 = vld [vmem:[#allocation5 + $0x470] sm:$0xf0]  ;;  %v3676_v25 = vld [vmem:[#allocation5 + $0x564] sm:$0xf]  ;;  %v2835_v27 = vor.u32 %v3612_v19, %v2832_v20  ;;  %v2502_v17 = vld [vmem:[#allocation5 + $0xc8] sm:$0xf] }
  0x64   :  { %v3088_v26 = vld [vmem:[#allocation5 + $0x570] sm:$0xf0]  ;;  %v2963_v28 = vor.u32 %v3644_v21, %v2960_v22  ;;  %v3576_v29 = vld [vmem:[#allocation5 + $0x244] sm:$0xf]  ;;  %1458 = vmatmul.bf16.vlgmr.msra.gmra.mxu2 %v4026_v9  ;;  %v3531_v19 = vld [vmem:[#allocation5 + $0xd4] sm:$0xf0] }
  0x65   :  { %1502 = vmatpush.bf16.msrb.mxu2 %v3155_v46  ;;  %v2688_v30 = vld [vmem:[#allocation5 + $0x250] sm:$0xf0]  ;;  %v3608_v31 = vld [vmem:[#allocation5 + $0x344] sm:$0xf]  ;;  %v3091_v35 = vor.u32 %v3676_v25, %v3088_v26  ;;  %v2630_v20 = vld [vmem:[#allocation5 + $0x1c8] sm:$0xf] }
  0x66   :  { %1465 = vmatpush.bf16.msra.mxu0 %v2739_v59  ;;  %v2816_v32 = vld [vmem:[#allocation5 + $0x350] sm:$0xf0]  ;;  %v3640_v33 = vld [vmem:[#allocation5 + $0x444] sm:$0xf]  ;;  %v2691_v36 = vor.u32 %v3576_v29, %v2688_v30  ;;  %v3563_v21 = vld [vmem:[#allocation5 + $0x1d4] sm:$0xf0] }
  0x67   :  { %1478 = vmatpush.bf16.msra.mxu1 %v2867_v62  ;;  %1491 = vmatpush.bf16.msra.mxu3 %v2995_v63  ;;  %v2944_v34 = vld [vmem:[#allocation5 + $0x450] sm:$0xf0]  ;;  %v3672_v37 = vld [vmem:[#allocation5 + $0x544] sm:$0xf]  ;;  %v2819_v39 = vor.u32 %v3608_v31, %v2816_v32  ;;  %v3535_v62 = vld [vmem:[#allocation5 + $0xf4] sm:$0xf0] }
  0x68   :  { %v3072_v38 = vld [vmem:[#allocation5 + $0x550] sm:$0xf0]  ;;  %v2947_v42 = vor.u32 %v3640_v33, %v2944_v34  ;;  %v3572_v43 = vld [vmem:[#allocation5 + $0x224] sm:$0xf]  ;;  %v2646_v63 = vld [vmem:[#allocation5 + $0x1e8] sm:$0xf]  ;;  %v2519_v13 = vor.u32 %v3535_v62, %v2518_v61 }
  0x69   :  { %1503 = vmatpush.bf16.msrb.mxu2 %v3139_v58  ;;  %v2672_v44 = vld [vmem:[#allocation5 + $0x230] sm:$0xf0]  ;;  %v3604_v45 = vld [vmem:[#allocation5 + $0x324] sm:$0xf]  ;;  %v3075_v49 = vor.u32 %v3672_v37, %v3072_v38  ;;  %v3599_v25 = vld [vmem:[#allocation5 + $0x2f4] sm:$0xf0] }
  0x6a   :  { %1466 = vmatpush.bf16.msra.mxu0 %v2723_v11  ;;  %v2800_v46 = vld [vmem:[#allocation5 + $0x330] sm:$0xf0]  ;;  %v3636_v47 = vld [vmem:[#allocation5 + $0x424] sm:$0xf]  ;;  %v2675_v50 = vor.u32 %v3572_v43, %v2672_v44  ;;  %v2886_v29 = vld [vmem:[#allocation5 + $0x3c8] sm:$0xf] }
  0x6b   :  { %1479 = vmatpush.bf16.msra.mxu1 %v2851_v14  ;;  %1492 = vmatpush.bf16.msra.mxu3 %v2979_v15  ;;  %v2928_v48 = vld [vmem:[#allocation5 + $0x430] sm:$0xf0]  ;;  %v3668_v51 = vld [vmem:[#allocation5 + $0x524] sm:$0xf]  ;;  %v2803_v54 = vor.u32 %v3604_v45, %v2800_v46  ;;  %v2647_v14 = vor.u32 %v3567_v0, %v2646_v63  ;;  %v2902_v15 = vld [vmem:[#allocation5 + $0x3e8] sm:$0xf] }
  0x6c   :  { %v3056_v52 = vld [vmem:[#allocation5 + $0x530] sm:$0xf0]  ;;  %v3568_v53 = vld [vmem:[#allocation5 + $0x204] sm:$0xf]  ;;  %v2931_v55 = vor.u32 %v3636_v47, %v2928_v48  ;;  %v2903_v26 = vor.u32 %v3631_v16, %v2902_v15  ;;  %v3627_v30 = vld [vmem:[#allocation5 + $0x3d4] sm:$0xf0] }
  0x6d   :  { %1504 = vmatpush.bf16.msrb.mxu2 %v3123_v10  ;;  %v2656_v56 = vld [vmem:[#allocation5 + $0x210] sm:$0xf0]  ;;  %v3600_v57 = vld [vmem:[#allocation5 + $0x304] sm:$0xf]  ;;  %v3059_v1 = vor.u32 %v3668_v51, %v3056_v52  ;;  %v2486_v31 = vld [vmem:[#allocation5 + $0xa8] sm:$0xf]  ;;  %v2887_v38 = vor.u32 %v3627_v30, %v2886_v29 }
  0x6e   :  { %1467 = vmatpush.bf16.msra.mxu0 %v2707_v24  ;;  %v2784_v58 = vld [vmem:[#allocation5 + $0x310] sm:$0xf0]  ;;  %v3632_v59 = vld [vmem:[#allocation5 + $0x404] sm:$0xf]  ;;  %v2659_v2 = vor.u32 %v3568_v53, %v2656_v56  ;;  %v2774_v24 = vld [vmem:[#allocation5 + $0x2e8] sm:$0xf] }
  0x6f   :  { %1480 = vmatpush.bf16.msra.mxu1 %v2835_v27  ;;  %1493 = vmatpush.bf16.msra.mxu3 %v2963_v28  ;;  %v2912_v60 = vld [vmem:[#allocation5 + $0x410] sm:$0xf0]  ;;  %v3664_v4 = vld [vmem:[#allocation5 + $0x504] sm:$0xf]  ;;  %v2787_v6 = vor.u32 %v3600_v57, %v2784_v58  ;;  %v2503_v27 = vor.u32 %v3531_v19, %v2502_v17  ;;  %v2631_v28 = vor.u32 %v3563_v21, %v2630_v20  ;;  %v3527_v32 = vld [vmem:[#allocation5 + $0xb4] sm:$0xf0] }
  0x70   :  { %v2915_v7 = vor.u32 %v3632_v59, %v2912_v60  ;;  %v3040_v10 = vld [vmem:[#allocation5 + $0x510] sm:$0xf0]  ;;  %v3696_v11 = vld [vmem:[#allocation5 + $0x604] sm:$0xf]  ;;  %v2614_v33 = vld [vmem:[#allocation5 + $0x1a8] sm:$0xf] }
  0x71   :  { %1505 = vmatpush.bf16.msrb.mxu2 %v3107_v23  ;;  %v3168_v12 = vld [vmem:[#allocation5 + $0x610] sm:$0xf0]  ;;  %v3043_v22 = vor.u32 %v3664_v4, %v3040_v10  ;;  %v3559_v34 = vld [vmem:[#allocation5 + $0x1b4] sm:$0xf0]  ;;  %v2870_v43 = vld [vmem:[#allocation5 + $0x3a8] sm:$0xf] }
  0x72   :  { %1468 = vmatpush.bf16.msra.mxu0 %v2691_v36  ;;  %v3171_v23 = vor.u32 %v3696_v11, %v3168_v12  ;;  %v2758_v36 = vld [vmem:[#allocation5 + $0x2c8] sm:$0xf]  ;;  %v3595_v37 = vld [vmem:[#allocation5 + $0x2d4] sm:$0xf0] }
  0x73   :  { %1481 = vmatpush.bf16.msra.mxu1 %v2819_v39  ;;  %1494 = vmatpush.bf16.msra.mxu3 %v2947_v42  ;;  %v2487_v39 = vor.u32 %v3527_v32, %v2486_v31  ;;  %v2615_v42 = vor.u32 %v3559_v34, %v2614_v33  ;;  %v3623_v44 = vld [vmem:[#allocation5 + $0x3b4] sm:$0xf0]  ;;  %v2470_v45 = vld [vmem:[#allocation5 + $0x88] sm:$0xf] }
  0x74   :  { %v3523_v46 = vld [vmem:[#allocation5 + $0x94] sm:$0xf0]  ;;  %v2598_v47 = vld [vmem:[#allocation5 + $0x188] sm:$0xf]  ;;  %v2871_v52 = vor.u32 %v3623_v44, %v2870_v43 }
  0x75   :  { %1506 = vmatpush.bf16.msrb.mxu2 %v3091_v35  ;;  %v2775_v35 = vor.u32 %v3599_v25, %v2774_v24  ;;  %v3555_v48 = vld [vmem:[#allocation5 + $0x194] sm:$0xf0]  ;;  %v2471_v53 = vor.u32 %v3523_v46, %v2470_v45  ;;  %v2454_v57 = vld [vmem:[#allocation5 + $0x68] sm:$0xf] }
  0x76   :  { %1469 = vmatpush.bf16.msra.mxu0 %v2675_v50  ;;  %v2742_v50 = vld [vmem:[#allocation5 + $0x2a8] sm:$0xf]  ;;  %v3591_v51 = vld [vmem:[#allocation5 + $0x2b4] sm:$0xf0] }
  0x77   :  { %1482 = vmatpush.bf16.msra.mxu1 %v2803_v54  ;;  %1495 = vmatpush.bf16.msra.mxu3 %v2931_v55  ;;  %v2599_v54 = vor.u32 %v3555_v48, %v2598_v47  ;;  %v2854_v55 = vld [vmem:[#allocation5 + $0x388] sm:$0xf]  ;;  %v3619_v56 = vld [vmem:[#allocation5 + $0x394] sm:$0xf0]  ;;  %v2743_v61 = vor.u32 %v3591_v51, %v2742_v50 }
  0x78   :  { %v3519_v58 = vld [vmem:[#allocation5 + $0x74] sm:$0xf0]  ;;  %v2582_v59 = vld [vmem:[#allocation5 + $0x168] sm:$0xf]  ;;  %v2855_v62 = vor.u32 %v3619_v56, %v2854_v55  ;;  %v2520_v55 = vld [vmem:[#allocation5 + $0xf8] sm:$0xf0] }
  0x79   :  { %1507 = vmatpush.bf16.msrb.mxu2 %v3075_v49  ;;  %v2759_v49 = vor.u32 %v3595_v37, %v2758_v36  ;;  %v3551_v60 = vld [vmem:[#allocation5 + $0x174] sm:$0xf0]  ;;  %v2726_v63 = vld [vmem:[#allocation5 + $0x288] sm:$0xf] }
  0x7a   :  { %1470 = vmatpush.bf16.msra.mxu0 %v2659_v2  ;;  %v3587_v0 = vld [vmem:[#allocation5 + $0x294] sm:$0xf0]  ;;  %v2583_v2 = vor.u32 %v3551_v60, %v2582_v59  ;;  %v2838_v4 = vld [vmem:[#allocation5 + $0x368] sm:$0xf] }
  0x7b   :  { %1483 = vmatpush.bf16.msra.mxu1 %v2787_v6  ;;  %1496 = vmatpush.bf16.msra.mxu3 %v2915_v7  ;;  %v3615_v6 = vld [vmem:[#allocation5 + $0x374] sm:$0xf0]  ;;  %v2438_v7 = vld [vmem:[#allocation5 + $0x48] sm:$0xf] }
  0x7c   :  { %v3515_v10 = vld [vmem:[#allocation5 + $0x54] sm:$0xf0]  ;;  %v2566_v11 = vld [vmem:[#allocation5 + $0x148] sm:$0xf] }
  0x7d   :  { %1508 = vmatpush.bf16.msrb.mxu2 %v3059_v1  ;;  %1471 = vmatmul.bf16.vlgmr.msra.gmra.mxu0 %v4020_v3  ;;  %v2455_v1 = vor.u32 %v3519_v58, %v2454_v57  ;;  %v3547_v12 = vld [vmem:[#allocation5 + $0x154] sm:$0xf0]  ;;  %v2822_v15 = vld [vmem:[#allocation5 + $0x348] sm:$0xf]  ;;  %v2439_v19 = vor.u32 %v3515_v10, %v2438_v7  ;;  %v3529_v7 = vld [vmem:[#allocation5 + $0xcc] sm:$0xf] }
  0x7e   :  { %1522 = vmatpush.bf16.msrb.mxu0 %v3171_v23  ;;  %1497 = vmatmul.bf16.vlgmr.msra.gmra.mxu3 %v4036_v40  ;;  %v2710_v16 = vld [vmem:[#allocation5 + $0x268] sm:$0xf]  ;;  %v3583_v17 = vld [vmem:[#allocation5 + $0x274] sm:$0xf0]  ;;  %v2567_v20 = vor.u32 %v3547_v12, %v2566_v11  ;;  %v2504_v10 = vld [vmem:[#allocation5 + $0xd8] sm:$0xf0] }
  0x7f   :  { %1528 = vmatpush.bf16.msrb.mxu1 %v2519_v13  ;;  %1541 = vmatpush.bf16.msrb.mxu3 %v2647_v14  ;;  %v2727_v13 = vor.u32 %v3587_v0, %v2726_v63  ;;  %v2839_v14 = vor.u32 %v3615_v6, %v2838_v4  ;;  %v3611_v21 = vld [vmem:[#allocation5 + $0x354] sm:$0xf0]  ;;  %v2550_v24 = vld [vmem:[#allocation5 + $0x128] sm:$0xf] }
  0x80   :  { %1484 = vmatmul.bf16.vlgmr.msra.gmra.mxu1 %v4024_v8  ;;  %v3511_v23 = vld [vmem:[#allocation5 + $0x34] sm:$0xf0]  ;;  %v2694_v29 = vld [vmem:[#allocation5 + $0x248] sm:$0xf] }
  0x81   :  { %1509 = vmatpush.bf16.msrb.mxu2 %v3043_v22  ;;  %v2422_v22 = vld [vmem:[#allocation5 + $0x28] sm:$0xf]  ;;  %v3543_v25 = vld [vmem:[#allocation5 + $0x134] sm:$0xf0] }
  0x82   :  { %1554 = vmatpush.bf16.msra.mxu0 %v2775_v35  ;;  %v3579_v30 = vld [vmem:[#allocation5 + $0x254] sm:$0xf0]  ;;  %v2423_v31 = vor.u32 %v3511_v23, %v2422_v22  ;;  %v2551_v32 = vor.u32 %v3543_v25, %v2550_v24  ;;  %v2406_v34 = vld [vmem:[#allocation5 + $0x8] sm:$0xf]  ;;  %v3525_v23 = vld [vmem:[#allocation5 + $0xac] sm:$0xf] }
  0x83   :  { %1529 = vmatpush.bf16.msrb.mxu1 %v2503_v27  ;;  %1542 = vmatpush.bf16.msrb.mxu3 %v2631_v28  ;;  %v2823_v27 = vor.u32 %v3611_v21, %v2822_v15  ;;  %v2806_v28 = vld [vmem:[#allocation5 + $0x328] sm:$0xf]  ;;  %v3607_v33 = vld [vmem:[#allocation5 + $0x334] sm:$0xf0]  ;;  %v2488_v24 = vld [vmem:[#allocation5 + $0xb8] sm:$0xf0] }
  0x84   :  { %1510 = vmatmul.bf16.vlgmr.msrb.gmra.mxu2 %v4038_v41  ;;  %v3507_v35 = vld [vmem:[#allocation5 + $0x14] sm:$0xf0]  ;;  %v2534_v36 = vld [vmem:[#allocation5 + $0x108] sm:$0xf]  ;;  %v2807_v45 = vor.u32 %v3607_v33, %v2806_v28 }
  0x85   :  { %1567 = vmatpush.bf16.msra.mxu2 %v2903_v26  ;;  %v2711_v26 = vor.u32 %v3583_v17, %v2710_v16  ;;  %v3539_v37 = vld [vmem:[#allocation5 + $0x114] sm:$0xf0]  ;;  %v3158_v43 = vld [vmem:[#allocation5 + $0x5e8] sm:$0xf]  ;;  %v2407_v48 = vor.u32 %v3507_v35, %v2406_v34  ;;  %v2507_v17 = vor.u32 %v3529_v7, %v2504_v10  ;;  %v3521_v35 = vld [vmem:[#allocation5 + $0x8c] sm:$0xf] }
  0x86   :  { %1555 = vmatpush.bf16.msra.mxu0 %v2759_v49  ;;  %v3695_v44 = vld [vmem:[#allocation5 + $0x5f4] sm:$0xf0]  ;;  %v2678_v46 = vld [vmem:[#allocation5 + $0x228] sm:$0xf]  ;;  %v2535_v49 = vor.u32 %v3539_v37, %v2534_v36  ;;  %v2472_v36 = vld [vmem:[#allocation5 + $0x98] sm:$0xf0] }
  0x87   :  { %1530 = vmatpush.bf16.msrb.mxu1 %v2487_v39  ;;  %1543 = vmatpush.bf16.msrb.mxu3 %v2615_v42  ;;  %v2695_v39 = vor.u32 %v3579_v30, %v2694_v29  ;;  %v3663_v42 = vld [vmem:[#allocation5 + $0x4f4] sm:$0xf0]  ;;  %v2790_v50 = vld [vmem:[#allocation5 + $0x308] sm:$0xf]  ;;  %v2491_v30 = vor.u32 %v3525_v23, %v2488_v24  ;;  %v3509_v7 = vld [vmem:[#allocation5 + $0x2c] sm:$0xf] }
  0x88   :  { %v3575_v47 = vld [vmem:[#allocation5 + $0x234] sm:$0xf0]  ;;  %v3014_v56 = vld [vmem:[#allocation5 + $0x4c8] sm:$0xf]  ;;  %v3549_v10 = vld [vmem:[#allocation5 + $0x16c] sm:$0xf] }
  0x89   :  { %1568 = vmatpush.bf16.msra.mxu2 %v2887_v38  ;;  %v3030_v38 = vld [vmem:[#allocation5 + $0x4e8] sm:$0xf]  ;;  %v3603_v51 = vld [vmem:[#allocation5 + $0x314] sm:$0xf0]  ;;  %v2679_v57 = vor.u32 %v3575_v47, %v2678_v46  ;;  %v2616_v46 = vld [vmem:[#allocation5 + $0x1b8] sm:$0xf0] }
  0x8a   :  { %1556 = vmatpush.bf16.msra.mxu0 %v2743_v61  ;;  %v3659_v58 = vld [vmem:[#allocation5 + $0x4d4] sm:$0xf0]  ;;  %v3142_v59 = vld [vmem:[#allocation5 + $0x5c8] sm:$0xf]  ;;  %v2791_v61 = vor.u32 %v3603_v51, %v2790_v50  ;;  %v2456_v50 = vld [vmem:[#allocation5 + $0x78] sm:$0xf0] }
  0x8b   :  { %1531 = vmatpush.bf16.msrb.mxu1 %v2471_v53  ;;  %1544 = vmatpush.bf16.msrb.mxu3 %v2599_v54  ;;  %v3159_v53 = vor.u32 %v3695_v44, %v3158_v43  ;;  %v3533_v54 = vld [vmem:[#allocation5 + $0xec] sm:$0xf]  ;;  %v3691_v60 = vld [vmem:[#allocation5 + $0x5d4] sm:$0xf0]  ;;  %v3015_v4 = vor.u32 %v3659_v58, %v3014_v56  ;;  %v2998_v11 = vld [vmem:[#allocation5 + $0x4a8] sm:$0xf]  ;;  %v2475_v44 = vor.u32 %v3521_v35, %v2472_v36 }
  0x8c   :  { %v3571_v63 = vld [vmem:[#allocation5 + $0x214] sm:$0xf0]  ;;  %v2523_v0 = vor.u32 %v3533_v54, %v2520_v55  ;;  %v3143_v6 = vor.u32 %v3691_v60, %v3142_v59  ;;  %v2982_v25 = vld [vmem:[#allocation5 + $0x488] sm:$0xf]  ;;  %v2600_v58 = vld [vmem:[#allocation5 + $0x198] sm:$0xf0] }
  0x8d   :  { %1569 = vmatpush.bf16.msra.mxu2 %v2871_v52  ;;  %3181 = vmatmul.msk.bf16.vlgmr.msrb.gmra.mxu0 %vm1342_vm0, %v4032_v18  ;;  %v3031_v52 = vor.u32 %v3663_v42, %v3030_v38  ;;  %v3687_v15 = vld [vmem:[#allocation5 + $0x5b4] sm:$0xf0]  ;;  %v2966_v37 = vld [vmem:[#allocation5 + $0x468] sm:$0xf]  ;;  %v3629_v23 = vld [vmem:[#allocation5 + $0x3ec] sm:$0xf] }
  0x8e   :  { %1557 = vmatpush.bf16.msra.mxu0 %v2727_v13  ;;  %v3655_v13 = vld [vmem:[#allocation5 + $0x4b4] sm:$0xf0]  ;;  %v2950_v51 = vld [vmem:[#allocation5 + $0x448] sm:$0xf]  ;;  %v2904_v24 = vld [vmem:[#allocation5 + $0x3f8] sm:$0xf0] }
  0x8f   :  { %1532 = vmatpush.bf16.msrb.mxu1 %v2455_v1  ;;  %1545 = vmatpush.bf16.msrb.mxu3 %v2583_v2  ;;  %v3174_v1 = vld [vmem:[#allocation5 + $0x608] sm:$0xf]  ;;  %v3699_v2 = vld [vmem:[#allocation5 + $0x614] sm:$0xf0]  ;;  %v2999_v21 = vor.u32 %v3655_v13, %v2998_v11  ;;  %v2584_v11 = vld [vmem:[#allocation5 + $0x178] sm:$0xf0] }
  0x90   :  { %v3175_v16 = vor.u32 %v3699_v2, %v3174_v1  ;;  %v3683_v28 = vld [vmem:[#allocation5 + $0x594] sm:$0xf0]  ;;  %v3062_v1 = vld [vmem:[#allocation5 + $0x528] sm:$0xf]  ;;  %v3032_v35 = vld [vmem:[#allocation5 + $0x4f8] sm:$0xf0] }
  0x91   :  { %1570 = vmatpush.bf16.msra.mxu2 %v2855_v62  ;;  %v2662_v62 = vld [vmem:[#allocation5 + $0x208] sm:$0xf]  ;;  %v3647_v38 = vld [vmem:[#allocation5 + $0x474] sm:$0xf0] }
  0x92   :  { %1558 = vmatpush.bf16.msra.mxu0 %v2711_v26  ;;  %v2663_v12 = vor.u32 %v3571_v63, %v2662_v62  ;;  %v3651_v26 = vld [vmem:[#allocation5 + $0x494] sm:$0xf0]  ;;  %v2967_v47 = vor.u32 %v3647_v38, %v2966_v37  ;;  %v2440_v62 = vld [vmem:[#allocation5 + $0x58] sm:$0xf0]  ;;  %v2934_v63 = vld [vmem:[#allocation5 + $0x428] sm:$0xf] }
  0x93   :  { %1533 = vmatpush.bf16.msrb.mxu1 %v2439_v19  ;;  %1546 = vmatpush.bf16.msrb.mxu3 %v2567_v20  ;;  %v3565_v19 = vld [vmem:[#allocation5 + $0x1ec] sm:$0xf]  ;;  %v2648_v20 = vld [vmem:[#allocation5 + $0x1f8] sm:$0xf0]  ;;  %v2983_v33 = vor.u32 %v3651_v26, %v2982_v25  ;;  %v3679_v42 = vld [vmem:[#allocation5 + $0x574] sm:$0xf0] }
  0x94   :  { %v2651_v29 = vor.u32 %v3565_v19, %v2648_v20  ;;  %v3675_v54 = vld [vmem:[#allocation5 + $0x554] sm:$0xf0]  ;;  %v3597_v20 = vld [vmem:[#allocation5 + $0x2ec] sm:$0xf]  ;;  %v2760_v38 = vld [vmem:[#allocation5 + $0x2d8] sm:$0xf0] }
  0x95   :  { %1571 = vmatpush.bf16.msra.mxu2 %v2839_v14  ;;  %v3126_v14 = vld [vmem:[#allocation5 + $0x5a8] sm:$0xf]  ;;  %v3671_v2 = vld [vmem:[#allocation5 + $0x534] sm:$0xf0]  ;;  %v3545_v26 = vld [vmem:[#allocation5 + $0x14c] sm:$0xf] }
  0x96   :  { %1559 = vmatpush.bf16.msra.mxu0 %v2695_v39  ;;  %v3127_v22 = vor.u32 %v3687_v15, %v3126_v14  ;;  %v3094_v39 = vld [vmem:[#allocation5 + $0x568] sm:$0xf]  ;;  %v3063_v13 = vor.u32 %v3671_v2, %v3062_v1  ;;  %v2424_v14 = vld [vmem:[#allocation5 + $0x38] sm:$0xf0]  ;;  %v3667_v19 = vld [vmem:[#allocation5 + $0x514] sm:$0xf0] }
  0x97   :  { %1534 = vmatpush.bf16.msrb.mxu1 %v2423_v31  ;;  %1547 = vmatpush.bf16.msrb.mxu3 %v2551_v32  ;;  %v3561_v31 = vld [vmem:[#allocation5 + $0x1cc] sm:$0xf]  ;;  %v2632_v32 = vld [vmem:[#allocation5 + $0x1d8] sm:$0xf0]  ;;  %v2918_v15 = vld [vmem:[#allocation5 + $0x408] sm:$0xf]  ;;  %v2427_v25 = vor.u32 %v3509_v7, %v2424_v14 }
  0x98   :  { %v2635_v43 = vor.u32 %v3561_v31, %v2632_v32  ;;  %v2907_v32 = vor.u32 %v3629_v23, %v2904_v24  ;;  %v3593_v37 = vld [vmem:[#allocation5 + $0x2cc] sm:$0xf]  ;;  %v3000_v1 = vld [vmem:[#allocation5 + $0x4b8] sm:$0xf0] }
  0x99   :  { %1572 = vmatpush.bf16.msra.mxu2 %v2823_v27  ;;  %v3110_v27 = vld [vmem:[#allocation5 + $0x588] sm:$0xf]  ;;  %v3585_v2 = vld [vmem:[#allocation5 + $0x28c] sm:$0xf]  ;;  %v3128_v24 = vld [vmem:[#allocation5 + $0x5b8] sm:$0xf0] }
  0x9a   :  { %1560 = vmatpush.bf16.msra.mxu0 %v2679_v57  ;;  %v3111_v34 = vor.u32 %v3683_v28, %v3110_v27  ;;  %v3553_v57 = vld [vmem:[#allocation5 + $0x18c] sm:$0xf]  ;;  %v2568_v27 = vld [vmem:[#allocation5 + $0x158] sm:$0xf0] }
  0x9b   :  { %1535 = vmatpush.bf16.msrb.mxu1 %v2407_v48  ;;  %1548 = vmatpush.bf16.msrb.mxu3 %v2535_v49  ;;  %v3095_v48 = vor.u32 %v3679_v42, %v3094_v39  ;;  %v3517_v49 = vld [vmem:[#allocation5 + $0x6c] sm:$0xf]  ;;  %v2571_v36 = vor.u32 %v3545_v26, %v2568_v27  ;;  %v2888_v42 = vld [vmem:[#allocation5 + $0x3d8] sm:$0xf0] }
  0x9c   :  { %v2459_v56 = vor.u32 %v3517_v49, %v2456_v50  ;;  %v3625_v39 = vld [vmem:[#allocation5 + $0x3cc] sm:$0xf]  ;;  %v3016_v49 = vld [vmem:[#allocation5 + $0x4d8] sm:$0xf0] }
  0x9d   :  { %1573 = vmatpush.bf16.msra.mxu2 %v2807_v45  ;;  %v3557_v45 = vld [vmem:[#allocation5 + $0x1ac] sm:$0xf]  ;;  %v2891_v50 = vor.u32 %v3625_v39, %v2888_v42 }
  0x9e   :  { %1536 = vmatmul.bf16.vlgmr.msrb.gmra.mxu1 %v4022_v5  ;;  %1549 = vmatmul.bf16.vlgmr.msrb.gmra.mxu3 %v4026_v9  ;;  %v2619_v55 = vor.u32 %v3557_v45, %v2616_v46  ;;  %v3617_v7 = vld [vmem:[#allocation5 + $0x38c] sm:$0xf] }
  0x9f   :  { %1580 = vmatpush.bf16.msra.mxu1 %v3031_v52  ;;  %1593 = vmatpush.bf16.msra.mxu3 %v3159_v53  ;;  %v3643_v52 = vld [vmem:[#allocation5 + $0x454] sm:$0xf0]  ;;  %v3078_v53 = vld [vmem:[#allocation5 + $0x548] sm:$0xf]  ;;  %v3685_v23 = vld [vmem:[#allocation5 + $0x5ac] sm:$0xf] }
  0xa0   :  { %1561 = vmatpush.bf16.msra.mxu0 %v2663_v12  ;;  %v2951_v59 = vor.u32 %v3643_v52, %v2950_v51  ;;  %v3079_v60 = vor.u32 %v3675_v54, %v3078_v53  ;;  %v3589_v52 = vld [vmem:[#allocation5 + $0x2ac] sm:$0xf]  ;;  %v2744_v53 = vld [vmem:[#allocation5 + $0x2b8] sm:$0xf0] }
  0xa1   :  { %1574 = vmatpush.bf16.msra.mxu2 %v2791_v61  ;;  %v3513_v61 = vld [vmem:[#allocation5 + $0x4c] sm:$0xf] }
  0xa2   :  { %v3621_v54 = vld [vmem:[#allocation5 + $0x3ac] sm:$0xf] }
  0xa3   :  { %1581 = vmatpush.bf16.msra.mxu1 %v3015_v4  ;;  %1594 = vmatpush.bf16.msra.mxu3 %v3143_v6  ;;  %v2603_v4 = vor.u32 %v3553_v57, %v2600_v58  ;;  %v2443_v6 = vor.u32 %v3513_v61, %v2440_v62  ;;  %v2536_v57 = vld [vmem:[#allocation5 + $0x118] sm:$0xf0]  ;;  %v3693_v58 = vld [vmem:[#allocation5 + $0x5ec] sm:$0xf]  ;;  %v2747_v61 = vor.u32 %v3589_v52, %v2744_v53 }
  0xa4   :  { %1575 = vmatmul.bf16.vlgmr.msra.gmra.mxu2 %v4024_v8  ;;  %1613 = vmatpush.bf16.msrb.mxu0 %v3175_v16  ;;  %v3635_v16 = vld [vmem:[#allocation5 + $0x414] sm:$0xf0]  ;;  %v3653_v62 = vld [vmem:[#allocation5 + $0x4ac] sm:$0xf]  ;;  %v3096_v53 = vld [vmem:[#allocation5 + $0x578] sm:$0xf0] }
  0xa5   :  { %1619 = vmatpush.bf16.msrb.mxu2 %v2523_v0  ;;  %1562 = vmatmul.bf16.vlgmr.msra.gmra.mxu0 %v4020_v3  ;;  %v3639_v0 = vld [vmem:[#allocation5 + $0x434] sm:$0xf0]  ;;  %v2919_v28 = vor.u32 %v3635_v16, %v2918_v15  ;;  %v3649_v15 = vld [vmem:[#allocation5 + $0x48c] sm:$0xf] }
  0xa6   :  { %v2935_v12 = vor.u32 %v3639_v0, %v2934_v63  ;;  %v3645_v27 = vld [vmem:[#allocation5 + $0x46c] sm:$0xf] }
  0xa7   :  { %1582 = vmatpush.bf16.msra.mxu1 %v2999_v21  ;;  %1595 = vmatpush.bf16.msra.mxu3 %v3127_v22  ;;  %v2587_v21 = vor.u32 %v3549_v10, %v2584_v11  ;;  %v2776_v22 = vld [vmem:[#allocation5 + $0x2f8] sm:$0xf0]  ;;  %v3689_v11 = vld [vmem:[#allocation5 + $0x5cc] sm:$0xf] }
  0xa8   :  { %1632 = vmatpush.bf16.msra.mxu0 %v2651_v29  ;;  %v2779_v31 = vor.u32 %v3597_v20, %v2776_v22  ;;  %v2856_v10 = vld [vmem:[#allocation5 + $0x398] sm:$0xf0]  ;;  %v3613_v22 = vld [vmem:[#allocation5 + $0x36c] sm:$0xf] }
  0xa9   :  { %1620 = vmatpush.bf16.msrb.mxu2 %v2507_v17  ;;  %v3046_v17 = vld [vmem:[#allocation5 + $0x508] sm:$0xf]  ;;  %v2859_v16 = vor.u32 %v3617_v7, %v2856_v10  ;;  %v2712_v20 = vld [vmem:[#allocation5 + $0x278] sm:$0xf0]  ;;  %v3677_v52 = vld [vmem:[#allocation5 + $0x56c] sm:$0xf] }
  0xaa   :  { %v3047_v29 = vor.u32 %v3667_v19, %v3046_v17  ;;  %v2984_v17 = vld [vmem:[#allocation5 + $0x498] sm:$0xf0]  ;;  %v3581_v19 = vld [vmem:[#allocation5 + $0x26c] sm:$0xf] }
  0xab   :  { %1583 = vmatpush.bf16.msra.mxu1 %v2983_v33  ;;  %1596 = vmatpush.bf16.msra.mxu3 %v3111_v34  ;;  %v2408_v33 = vld [vmem:[#allocation5 + $0x18] sm:$0xf0]  ;;  %v3661_v34 = vld [vmem:[#allocation5 + $0x4ec] sm:$0xf]  ;;  %v2715_v26 = vor.u32 %v3581_v19, %v2712_v20 }
  0xac   :  { %1633 = vmatpush.bf16.msra.mxu0 %v2635_v43  ;;  %v3541_v43 = vld [vmem:[#allocation5 + $0x12c] sm:$0xf]  ;;  %v3035_v46 = vor.u32 %v3661_v34, %v3032_v35  ;;  %v3131_v34 = vor.u32 %v3685_v23, %v3128_v24  ;;  %v3731_v7 = vld [vmem:[#allocation8 + $0xf4] sm:$0xf0] }
  0xad   :  { %1621 = vmatpush.bf16.msrb.mxu2 %v2491_v30  ;;  %v3505_v30 = vld [vmem:[#allocation5 + $0xc] sm:$0xf]  ;;  %v3715_v10 = vld [vmem:[#allocation8 + $0x74] sm:$0xf0] }
  0xae   :  { %v2411_v45 = vor.u32 %v3505_v30, %v2408_v33  ;;  %v2968_v30 = vld [vmem:[#allocation5 + $0x478] sm:$0xf0]  ;;  %v3609_v35 = vld [vmem:[#allocation5 + $0x34c] sm:$0xf] }
  0xaf   :  { %1584 = vmatpush.bf16.msra.mxu1 %v2967_v47  ;;  %1597 = vmatpush.bf16.msra.mxu3 %v3095_v48  ;;  %v2763_v47 = vor.u32 %v3593_v37, %v2760_v38  ;;  %v3657_v48 = vld [vmem:[#allocation5 + $0x4cc] sm:$0xf]  ;;  %v3112_v38 = vld [vmem:[#allocation5 + $0x598] sm:$0xf0]  ;;  %v2971_v39 = vor.u32 %v3645_v27, %v2968_v30 }
  0xb0   :  { %1634 = vmatpush.bf16.msra.mxu0 %v2619_v55  ;;  %v2872_v55 = vld [vmem:[#allocation5 + $0x3b8] sm:$0xf0]  ;;  %v3681_v37 = vld [vmem:[#allocation5 + $0x58c] sm:$0xf] }
  0xb1   :  { %1622 = vmatpush.bf16.msrb.mxu2 %v2475_v44  ;;  %v2552_v44 = vld [vmem:[#allocation5 + $0x138] sm:$0xf0]  ;;  %v2875_v63 = vor.u32 %v3621_v54, %v2872_v55  ;;  %v3729_v27 = vld [vmem:[#allocation8 + $0xe4] sm:$0xf0] }
  0xb2   :  { %v2555_v51 = vor.u32 %v3541_v43, %v2552_v44  ;;  %v3641_v43 = vld [vmem:[#allocation5 + $0x44c] sm:$0xf]  ;;  %v2920_v20 = vld [vmem:[#allocation5 + $0x418] sm:$0xf0] }
  0xb3   :  { %1585 = vmatpush.bf16.msra.mxu1 %v2951_v59  ;;  %1598 = vmatpush.bf16.msra.mxu3 %v3079_v60  ;;  %v3160_v59 = vld [vmem:[#allocation5 + $0x5f8] sm:$0xf0]  ;;  %v3019_v60 = vor.u32 %v3657_v48, %v3016_v49  ;;  %v3115_v48 = vor.u32 %v3681_v37, %v3112_v38  ;;  %v3605_v49 = vld [vmem:[#allocation5 + $0x32c] sm:$0xf] }
  0xb4   :  { %1635 = vmatpush.bf16.msra.mxu0 %v2603_v4  ;;  %v2728_v4 = vld [vmem:[#allocation5 + $0x298] sm:$0xf0]  ;;  %v3669_v30 = vld [vmem:[#allocation5 + $0x52c] sm:$0xf] }
  0xb5   :  { %1623 = vmatpush.bf16.msrb.mxu2 %v2459_v56  ;;  %3182 = vmatmul.msk.bf16.vlgmr.msrb.gmra.mxu0 %vm1342_vm0, %v4032_v18  ;;  %v3537_v56 = vld [vmem:[#allocation5 + $0x10c] sm:$0xf]  ;;  %v2731_v14 = vor.u32 %v3585_v2, %v2728_v4  ;;  %v3242_v2 = vld [vmem:[#allocation8 + $0x70] sm:$0xf] }
  0xb6   :  { %v2539_v0 = vor.u32 %v3537_v56, %v2536_v57  ;;  %v3637_v57 = vld [vmem:[#allocation5 + $0x42c] sm:$0xf]  ;;  %v3243_v23 = vor.u32 %v3715_v10, %v3242_v2 }
  0xb7   :  { %1586 = vmatpush.bf16.msra.mxu1 %v2935_v12  ;;  %1599 = vmatpush.bf16.msra.mxu3 %v3063_v13  ;;  %v3144_v12 = vld [vmem:[#allocation5 + $0x5d8] sm:$0xf0]  ;;  %v3003_v13 = vor.u32 %v3653_v62, %v3000_v1  ;;  %v3601_v62 = vld [vmem:[#allocation5 + $0x30c] sm:$0xf]  ;;  %v3099_v1 = vor.u32 %v3677_v52, %v3096_v53  ;;  %v3282_v52 = vld [vmem:[#allocation8 + $0xc0] sm:$0xf] }
  0xb8   :  { %1636 = vmatpush.bf16.msra.mxu0 %v2587_v21  ;;  %v3147_v21 = vor.u32 %v3689_v11, %v3144_v12  ;;  %v3673_v11 = vld [vmem:[#allocation5 + $0x54c] sm:$0xf]  ;;  %v3080_v12 = vld [vmem:[#allocation5 + $0x558] sm:$0xf0] }
  0xb9   :  { %1624 = vmatpush.bf16.msrb.mxu2 %v2443_v6  ;;  %v3163_v6 = vor.u32 %v3693_v58, %v3160_v59  ;;  %v2936_v58 = vld [vmem:[#allocation5 + $0x438] sm:$0xf0]  ;;  %v3569_v59 = vld [vmem:[#allocation5 + $0x20c] sm:$0xf]  ;;  %v3083_v24 = vor.u32 %v3673_v11, %v3080_v12 }
  0xba   :  { %v3725_v53 = vld [vmem:[#allocation8 + $0xc4] sm:$0xf0] }
  0xbb   :  { %1587 = vmatpush.bf16.msra.mxu1 %v2919_v28  ;;  %1600 = vmatpush.bf16.msra.mxu3 %v3047_v29  ;;  %v3721_v2 = vld [vmem:[#allocation8 + $0xa4] sm:$0xf0] }
  0xbc   :  { %1637 = vmatpush.bf16.msra.mxu0 %v2571_v36  ;;  %v2824_v36 = vld [vmem:[#allocation5 + $0x358] sm:$0xf0] }
  0xbd   :  { %1625 = vmatpush.bf16.msrb.mxu2 %v2427_v25  ;;  %v2987_v25 = vor.u32 %v3649_v15, %v2984_v17 }
  0xbe   :  { %1588 = vmatmul.bf16.vlgmr.msra.gmra.mxu1 %v4036_v40  ;;  %1601 = vmatmul.bf16.vlgmr.msra.gmra.mxu3 %v4038_v41 }
  0xbf   :  { %1645 = vmatpush.bf16.msrb.mxu1 %v2779_v31  ;;  %1658 = vmatpush.bf16.msrb.mxu3 %v2907_v32  ;;  %v3577_v31 = vld [vmem:[#allocation5 + $0x24c] sm:$0xf]  ;;  %v2696_v32 = vld [vmem:[#allocation5 + $0x258] sm:$0xf0] }
  0xc0   :  { %1638 = vmatpush.bf16.msra.mxu0 %v2555_v51  ;;  %v2699_v42 = vor.u32 %v3577_v31, %v2696_v32  ;;  %v4066_v51 = vld [vmem:[#allocation7] sm:$0xf]  ;;  %v3064_v31 = vld [vmem:[#allocation5 + $0x538] sm:$0xf0] }
  0xc1   :  { %1626 = vmatpush.bf16.msrb.mxu2 %v2411_v45  ;;  %v4059_v28 = vpop.f32.mrf.mxu0  ;;  %v2827_v45 = vor.u32 %v3609_v35, %v2824_v36 }
  0xc3   :  { %1646 = vmatpush.bf16.msrb.mxu1 %v2763_v47  ;;  %1659 = vmatpush.bf16.msrb.mxu3 %v2891_v50  ;;  %v4062_v33 = vpop.f32.mrf.mxu1  ;;  %v3573_v47 = vld [vmem:[#allocation5 + $0x22c] sm:$0xf]  ;;  %v2808_v50 = vld [vmem:[#allocation5 + $0x338] sm:$0xf0] }
  0xc4   :  { %1627 = vmatmul.bf16.vlgmr.msrb.gmra.mxu2 %v4022_v5  ;;  %1639 = vmatpush.bf16.msra.mxu0 %v2539_v0  ;;  %v2840_v5 = vld [vmem:[#allocation5 + $0x378] sm:$0xf0] }
  0xc5   :  { %1671 = vmatpush.bf16.msra.mxu2 %v3035_v46  ;;  %v2843_v29 = vor.u32 %v3613_v22, %v2840_v5  ;;  %v2952_v46 = vld [vmem:[#allocation5 + $0x458] sm:$0xf0]  ;;  %v3697_v22 = vld [vmem:[#allocation5 + $0x60c] sm:$0xf] }
  0xc6   :  { %v2955_v55 = vor.u32 %v3641_v43, %v2952_v46  ;;  %v3290_v43 = vld [vmem:[#allocation8 + $0xd0] sm:$0xf]  ;;  %v3711_v46 = vld [vmem:[#allocation8 + $0x54] sm:$0xf0] }
  0xc7   :  { %1647 = vmatpush.bf16.msrb.mxu1 %v2747_v61  ;;  %1660 = vmatpush.bf16.msrb.mxu3 %v2875_v63  ;;  %v4064_v44 = vpop.f32.mrf.mxu2  ;;  %v2664_v61 = vld [vmem:[#allocation5 + $0x218] sm:$0xf0] }
  0xc8   :  { %1684 = vmatpush.bf16.msrb.mxu0 %v3163_v6  ;;  %v4068_v54 = vpop.f32.mrf.mxu3  ;;  %v2792_v63 = vld [vmem:[#allocation5 + $0x318] sm:$0xf0]  ;;  %v3306_v6 = vld [vmem:[#allocation8 + $0xf0] sm:$0xf]  ;;  %v2667_v15 = vor.u32 %v3569_v59, %v2664_v61 }
  0xc9   :  { %1672 = vmatpush.bf16.msra.mxu2 %v3019_v60  ;;  %1640 = vmatmul.bf16.vlgmr.msra.gmra.mxu0 %v4026_v9  ;;  %v2680_v9 = vld [vmem:[#allocation5 + $0x238] sm:$0xf0]  ;;  %v2811_v60 = vor.u32 %v3605_v49, %v2808_v50  ;;  %v1357_v0 = vpop.f32.mrf.mxu0  ;;  %v2795_v19 = vor.u32 %v3601_v62, %v2792_v63  ;;  %v3307_v5 = vor.u32 %v3731_v7, %v3306_v6  ;;  %v3210_v61 = vld [vmem:[#allocation8 + $0x30] sm:$0xf]  ;;  %v3202_v6 = vld [vmem:[#allocation8 + $0x20] sm:$0xf] }
  0xca   :  { %v2683_v56 = vor.u32 %v3573_v47, %v2680_v9  ;;  %v3665_v47 = vld [vmem:[#allocation5 + $0x50c] sm:$0xf]  ;;  %v3048_v9 = vld [vmem:[#allocation5 + $0x518] sm:$0xf0] }
  0xcb   :  { %1648 = vmatpush.bf16.msrb.mxu1 %v2731_v14  ;;  %1661 = vmatpush.bf16.msrb.mxu3 %v2859_v16  ;;  %v1370_v4 = vpop.f32.mrf.mxu1  ;;  %v2939_v14 = vor.u32 %v3637_v57, %v2936_v58  ;;  %v3633_v16 = vld [vmem:[#allocation5 + $0x40c] sm:$0xf]  ;;  %v3051_v50 = vor.u32 %v3665_v47, %v3048_v9  ;;  %v3274_v57 = vld [vmem:[#allocation8 + $0xb0] sm:$0xf]  ;;  %v3723_v58 = vld [vmem:[#allocation8 + $0xb4] sm:$0xf0] }
  0xcc   :  { %1685 = vmatpush.bf16.msrb.mxu0 %v3147_v21  ;;  %v3234_v21 = vld [vmem:[#allocation8 + $0x60] sm:$0xf]  ;;  %v2923_v32 = vor.u32 %v3633_v16, %v2920_v20  ;;  %v3707_v62 = vld [vmem:[#allocation8 + $0x34] sm:$0xf0]  ;;  %v3705_v7 = vld [vmem:[#allocation8 + $0x24] sm:$0xf0] }
  0xcd   :  { %1673 = vmatpush.bf16.msra.mxu2 %v3003_v13  ;;  %v354_v13 = vperm.slane %v4066_v51, 0  ;;  %v3203_v11 = vor.u32 %v3705_v7, %v3202_v6  ;;  %v3194_v16 = vld [vmem:[#allocation8 + $0x10] sm:$0xf]  ;;  %v3276_v6 = vld [vmem:[#allocation8 + $0xb8] sm:$0xf0] }
  0xcf   :  { %1649 = vmatpush.bf16.msrb.mxu1 %v2715_v26  ;;  %1662 = vmatpush.bf16.msrb.mxu3 %v2843_v29  ;;  %v1383_v17 = vpop.f32.mrf.mxu2  ;;  %v3298_v26 = vld [vmem:[#allocation8 + $0xe0] sm:$0xf]  ;;  %v3713_v29 = vld [vmem:[#allocation8 + $0x64] sm:$0xf0]  ;;  %v1356_v35 = vadd.f32 %v4059_v28, %v354_v13  ;;  %v3258_v13 = vld [vmem:[#allocation8 + $0x90] sm:$0xf] }
  0xd0   :  { %1686 = vmatpush.bf16.msrb.mxu0 %v3131_v34  ;;  %v1396_v34 = vpop.f32.mrf.mxu3  ;;  %v3299_v37 = vor.u32 %v3729_v27, %v3298_v26  ;;  %v3235_v38 = vor.u32 %v3713_v29, %v3234_v21  ;;  %v3730_v26 = vld [vmem:[#allocation8 + $0xf4] sm:$0xf]  ;;  %v3308_v27 = vld [vmem:[#allocation8 + $0xf8] sm:$0xf0] }
  0xd1   :  { %1674 = vmatpush.bf16.msra.mxu2 %v2987_v25  ;;  %v3176_v25 = vld [vmem:[#allocation5 + $0x618] sm:$0xf0]  ;;  %v1369_v28 = vadd.f32 %v4062_v33, %v1356_v35  ;;  %v3714_v29 = vld [vmem:[#allocation8 + $0x74] sm:$0xf]  ;;  %v3311_v35 = vor.u32 %v3730_v26, %v3308_v27  ;;  %v3741_v26 = vld [vmem:[#allocation8 + $0x144] sm:$0xf0] }
  0xd2   :  { %v3179_v36 = vor.u32 %v3697_v22, %v3176_v25  ;;  %v3186_v22 = vld [vmem:[#allocation8] sm:$0xf]  ;;  %v3701_v25 = vld [vmem:[#allocation8 + $0x4] sm:$0xf0] }
  0xd3   :  { %1650 = vmatpush.bf16.msrb.mxu1 %v2699_v42  ;;  %1663 = vmatpush.bf16.msrb.mxu3 %v2827_v45  ;;  %v3226_v42 = vld [vmem:[#allocation8 + $0x50] sm:$0xf]  ;;  %v3727_v45 = vld [vmem:[#allocation8 + $0xd4] sm:$0xf0] }
  0xd4   :  { %1687 = vmatpush.bf16.msrb.mxu0 %v3115_v48  ;;  %v3291_v48 = vor.u32 %v3727_v45, %v3290_v43  ;;  %v3227_v49 = vor.u32 %v3711_v46, %v3226_v42  ;;  %v3712_v42 = vld [vmem:[#allocation8 + $0x64] sm:$0xf]  ;;  %v3236_v43 = vld [vmem:[#allocation8 + $0x68] sm:$0xf0] }
  0xd5   :  { %1675 = vmatpush.bf16.msra.mxu2 %v2971_v39  ;;  %v3067_v39 = vor.u32 %v3669_v30, %v3064_v31  ;;  %v3244_v30 = vld [vmem:[#allocation8 + $0x78] sm:$0xf0]  ;;  %v3239_v9 = vor.u32 %v3712_v42, %v3236_v43  ;;  %v3252_v43 = vld [vmem:[#allocation8 + $0x88] sm:$0xf0] }
  0xd7   :  { %1651 = vmatpush.bf16.msrb.mxu1 %v2683_v56  ;;  %1664 = vmatpush.bf16.msrb.mxu3 %v2811_v60  ;;  %v1382_v56 = vadd.f32 %v4064_v44, %v1369_v28  ;;  %v1433_v59 = vpop.f32.mrf.mxu2  ;;  %v3211_v44 = vor.u32 %v3707_v62, %v3210_v61  ;;  %v3710_v28 = vld [vmem:[#allocation8 + $0x54] sm:$0xf]  ;;  %v3220_v62 = vld [vmem:[#allocation8 + $0x48] sm:$0xf0] }
  0xd8   :  { %1688 = vmatpush.bf16.msrb.mxu0 %v3099_v1  ;;  %v3266_v1 = vld [vmem:[#allocation8 + $0xa0] sm:$0xf] }
  0xd9   :  { %1676 = vmatpush.bf16.msra.mxu2 %v2955_v55  ;;  %v3709_v55 = vld [vmem:[#allocation8 + $0x44] sm:$0xf0]  ;;  %v1395_v0 = vadd.f32 %v4068_v54, %v1382_v56  ;;  %v3267_v10 = vor.u32 %v3721_v2, %v3266_v1 }
  0xda   :  { %v1407_v60 = vpop.f32.mrf.mxu0 }
  0xdb   :  { %1652 = vmatpush.bf16.msrb.mxu1 %v2667_v15  ;;  %1665 = vmatpush.bf16.msrb.mxu3 %v2795_v19  ;;  %v1420_v63 = vpop.f32.mrf.mxu1  ;;  %v1408_v4 = vadd.f32 %v1407_v60, %v1395_v0  ;;  %v3284_v60 = vld [vmem:[#allocation8 + $0xc8] sm:$0xf0]  ;;  %v3743_v0 = vld [vmem:[#allocation8 + $0x154] sm:$0xf0] }
  0xdc   :  { %1689 = vmatpush.bf16.msrb.mxu0 %v3083_v24 }
  0xdd   :  { %1677 = vmatpush.bf16.msra.mxu2 %v2939_v14  ;;  %v3719_v14 = vld [vmem:[#allocation8 + $0x94] sm:$0xf0]  ;;  %v1421_v15 = vadd.f32 %v1420_v63, %v1408_v4  ;;  %v3354_v63 = vld [vmem:[#allocation8 + $0x150] sm:$0xf]  ;;  %v3722_v4 = vld [vmem:[#allocation8 + $0xb4] sm:$0xf] }
  0xde   :  { %1653 = vmatmul.bf16.vlgmr.msrb.gmra.mxu1 %v4020_v3  ;;  %1666 = vmatmul.bf16.vlgmr.msrb.gmra.mxu3 %v4024_v8  ;;  %v3218_v3 = vld [vmem:[#allocation8 + $0x40] sm:$0xf]  ;;  %v3283_v8 = vor.u32 %v3725_v53, %v3282_v52  ;;  %v3259_v20 = vor.u32 %v3719_v14, %v3258_v13  ;;  %v3370_v52 = vld [vmem:[#allocation8 + $0x170] sm:$0xf]  ;;  %v3747_v53 = vld [vmem:[#allocation8 + $0x174] sm:$0xf0]  ;;  %v3355_v7 = vor.u32 %v3743_v0, %v3354_v63 }
  0xdf   :  { %2121 = vmatpush.bf16.msra.mxu1 %v3307_v5  ;;  %2108 = vmatpush.bf16.msra.mxu3 %v3243_v23  ;;  %v3219_v33 = vor.u32 %v3709_v55, %v3218_v3  ;;  %v1435_v54 = vpop.f32.mrf.mxu2  ;;  %v3250_v5 = vld [vmem:[#allocation8 + $0x80] sm:$0xf]  ;;  %v3717_v23 = vld [vmem:[#allocation8 + $0x84] sm:$0xf0]  ;;  %v1434_v24 = vadd.f32 %v1433_v59, %v1421_v15  ;;  %v3371_v3 = vor.u32 %v3747_v53, %v3370_v52  ;;  %v3724_v59 = vld [vmem:[#allocation8 + $0xc4] sm:$0xf] }
  0xe0   :  { %1690 = vmatpush.bf16.msrb.mxu0 %v3067_v39  ;;  %v3251_v31 = vor.u32 %v3717_v23, %v3250_v5  ;;  %v3300_v39 = vld [vmem:[#allocation8 + $0xe8] sm:$0xf0]  ;;  %v3362_v55 = vld [vmem:[#allocation8 + $0x160] sm:$0xf]  ;;  %v3287_v1 = vor.u32 %v3724_v59, %v3284_v60  ;;  %v3279_v14 = vor.u32 %v3722_v4, %v3276_v6  ;;  %v3720_v54 = vld [vmem:[#allocation8 + $0xa4] sm:$0xf] }
  0xe1   :  { %1678 = vmatpush.bf16.msra.mxu2 %v2923_v32  ;;  %v3187_v32 = vor.u32 %v3701_v25, %v3186_v22  ;;  %v3718_v5 = vld [vmem:[#allocation8 + $0x94] sm:$0xf]  ;;  %v3346_v25 = vld [vmem:[#allocation8 + $0x140] sm:$0xf]  ;;  %v3322_v53 = vld [vmem:[#allocation8 + $0x110] sm:$0xf] }
  0xe2   :  { %v1409_v17 = vpop.f32.mrf.mxu0  ;;  %v3314_v59 = vld [vmem:[#allocation8 + $0x100] sm:$0xf]  ;;  %v3733_v60 = vld [vmem:[#allocation8 + $0x104] sm:$0xf0]  ;;  %v3746_v0 = vld [vmem:[#allocation8 + $0x174] sm:$0xf] }
  0xe3   :  { %2122 = vmatpush.bf16.msra.mxu1 %v3299_v37  ;;  %2109 = vmatpush.bf16.msra.mxu3 %v3235_v38  ;;  %v1446_v12 = vpop.f32.mrf.mxu3  ;;  %v1422_v19 = vpop.f32.mrf.mxu1  ;;  %v3247_v37 = vor.u32 %v3714_v29, %v3244_v30  ;;  %v3728_v38 = vld [vmem:[#allocation8 + $0xe4] sm:$0xf]  ;;  %v3204_v17 = vld [vmem:[#allocation8 + $0x28] sm:$0xf0]  ;;  %v3196_v30 = vld [vmem:[#allocation8 + $0x18] sm:$0xf0] }
  0xe4   :  { %1679 = vmatmul.bf16.vlgmr.msra.gmra.mxu2 %v4036_v40  ;;  %1691 = vmatpush.bf16.msrb.mxu0 %v3051_v50  ;;  %v3275_v40 = vor.u32 %v3723_v58, %v3274_v57  ;;  %v3303_v46 = vor.u32 %v3728_v38, %v3300_v39  ;;  %v3228_v50 = vld [vmem:[#allocation8 + $0x58] sm:$0xf0]  ;;  %v3708_v58 = vld [vmem:[#allocation8 + $0x44] sm:$0xf] }
  0xe5   :  { %1704 = vmatpush.bf16.msrb.mxu2 %v3179_v36  ;;  %v1710_v36 = vmax.f32 %v1434_v24, 0.0  ;;  %v3231_v57 = vor.u32 %v3710_v28, %v3228_v50  ;;  %v3223_v2 = vor.u32 %v3708_v58, %v3220_v62  ;;  %v3260_v24 = vld [vmem:[#allocation8 + $0x98] sm:$0xf0]  ;;  %v3716_v38 = vld [vmem:[#allocation8 + $0x84] sm:$0xf]  ;;  %v3315_v62 = vor.u32 %v3733_v60, %v3314_v59 }
  0xe7   :  { %2123 = vmatpush.bf16.msra.mxu1 %v3291_v48  ;;  %2110 = vmatpush.bf16.msra.mxu3 %v3227_v49  ;;  %v1459_v45 = vpop.f32.mrf.mxu2  ;;  %v4082_v47 = vpack.c.bf16 %v1710_v36, %v1710_v36  ;;  %v3726_v48 = vld [vmem:[#allocation8 + $0xd4] sm:$0xf]  ;;  %v3292_v49 = vld [vmem:[#allocation8 + $0xd8] sm:$0xf0] }
  0xe8   :  { %1692 = vmatmul.bf16.vlgmr.msrb.gmra.mxu0 %v4038_v41  ;;  %v3703_v41 = vld [vmem:[#allocation8 + $0x14] sm:$0xf0] }
  0xe9   :  { %v3195_v21 = vor.u32 %v3703_v41, %v3194_v16  ;;  %2134 = vmatpush.bf16.msra.mxu2 %v3371_v3  ;;  %v3268_v16 = vld [vmem:[#allocation8 + $0xa8] sm:$0xf0]  ;;  %v3704_v41 = vld [vmem:[#allocation8 + $0x24] sm:$0xf]  ;;  %v3735_v3 = vld [vmem:[#allocation8 + $0x114] sm:$0xf0] }
  0xea   :  { %v3271_v22 = vor.u32 %v3720_v54, %v3268_v16  ;;  %v3207_v23 = vor.u32 %v3704_v41, %v3204_v17  ;;  %v3738_v41 = vld [vmem:[#allocation8 + $0x134] sm:$0xf]  ;;  %v3340_v17 = vld [vmem:[#allocation8 + $0x138] sm:$0xf0] }
  0xeb   :  { %2124 = vmatpush.bf16.msra.mxu1 %v3283_v8  ;;  %2111 = vmatpush.bf16.msra.mxu3 %v3219_v33  ;;  %v1448_v34 = vpop.f32.mrf.mxu3  ;;  %v3295_v8 = vor.u32 %v3726_v48, %v3292_v49  ;;  %v3745_v33 = vld [vmem:[#allocation8 + $0x164] sm:$0xf0]  ;;  %v3255_v49 = vor.u32 %v3716_v38, %v3252_v43  ;;  %v3316_v43 = vld [vmem:[#allocation8 + $0x108] sm:$0xf0] }
  0xec   :  { %v3363_v61 = vor.u32 %v3745_v33, %v3362_v55  ;;  %v3739_v34 = vld [vmem:[#allocation8 + $0x134] sm:$0xf0] }
  0xee   :  { %2135 = vmatpush.bf16.msra.mxu2 %v3363_v61 }
  0xef   :  { %2125 = vmatpush.bf16.msra.mxu1 %v3275_v40  ;;  %2112 = vmatpush.bf16.msra.mxu3 %v3211_v44  ;;  %v1461_v40 = vpop.f32.mrf.mxu2 }
  0xf0   :  { %v3372_v40 = vld [vmem:[#allocation8 + $0x178] sm:$0xf0] }
  0xf2   :  { %2136 = vmatpush.bf16.msra.mxu2 %v3355_v7  ;;  %v3742_v7 = vld [vmem:[#allocation8 + $0x154] sm:$0xf] }
  0xf3   :  { %2126 = vmatpush.bf16.msra.mxu1 %v3267_v10  ;;  %2113 = vmatpush.bf16.msra.mxu3 %v3203_v11  ;;  %v3706_v11 = vld [vmem:[#allocation8 + $0x34] sm:$0xf] }
  0xf4   :  { %3183 = vmatmul.msk.bf16.vlgmr.msrb.gmra.mxu2 %vm1342_vm0, %v4032_v18  ;;  %v355_v18 = vperm.slane %v4066_v51, 1 }
  0xf6   :  { %v1447_v56 = vadd.f32 %v1446_v12, %v355_v18  ;;  %v3212_v12 = vld [vmem:[#allocation8 + $0x38] sm:$0xf0]  ;;  %v3737_v18 = vld [vmem:[#allocation8 + $0x124] sm:$0xf0] }
  0xf7   :  { %2127 = vmatpush.bf16.msra.mxu1 %v3259_v20  ;;  %2114 = vmatpush.bf16.msra.mxu3 %v3195_v21  ;;  %v3215_v15 = vor.u32 %v3706_v11, %v3212_v12  ;;  %v3702_v21 = vld [vmem:[#allocation8 + $0x14] sm:$0xf] }
  0xf8   :  { %v1460_v44 = vadd.f32 %v1459_v45, %v1447_v56  ;;  %v3199_v42 = vor.u32 %v3702_v21, %v3196_v30  ;;  %v3330_v45 = vld [vmem:[#allocation8 + $0x120] sm:$0xf]  ;;  %v3763_v21 = vld [vmem:[#allocation8 + $0x1f4] sm:$0xf0] }
  0xf9   :  { %v3331_v50 = vor.u32 %v3737_v18, %v3330_v45 }
  0xfa   :  { %v1472_v10 = vpop.f32.mrf.mxu0 }
  0xfb   :  { %2128 = vmatpush.bf16.msra.mxu1 %v3251_v31  ;;  %2115 = vmatpush.bf16.msra.mxu3 %v3187_v32  ;;  %v1473_v13 = vadd.f32 %v1472_v10, %v1460_v44  ;;  %v3347_v31 = vor.u32 %v3741_v26, %v3346_v25  ;;  %v3338_v32 = vld [vmem:[#allocation8 + $0x130] sm:$0xf]  ;;  %v3375_v44 = vor.u32 %v3746_v0, %v3372_v40  ;;  %v3356_v10 = vld [vmem:[#allocation8 + $0x158] sm:$0xf0]  ;;  %v3761_v25 = vld [vmem:[#allocation8 + $0x1e4] sm:$0xf0] }
  0xfc   :  { %v3339_v39 = vor.u32 %v3739_v34, %v3338_v32  ;;  %v3359_v11 = vor.u32 %v3742_v7, %v3356_v10  ;;  %v3324_v32 = vld [vmem:[#allocation8 + $0x118] sm:$0xf0]  ;;  %v356_v34 = vperm.slane %v4066_v51, 2 }
  0xfd   :  { %v1485_v19 = vpop.f32.mrf.mxu1  ;;  %2137 = vmatpush.bf16.msra.mxu2 %v3347_v31  ;;  %v3734_v31 = vld [vmem:[#allocation8 + $0x114] sm:$0xf] }
  0xfe   :  { %2116 = vmatmul.bf16.vlgmr.msra.gmra.mxu3 %v4082_v47  ;;  %v1486_v20 = vadd.f32 %v1485_v19, %v1473_v13  ;;  %v3740_v13 = vld [vmem:[#allocation8 + $0x144] sm:$0xf]  ;;  %v3343_v19 = vor.u32 %v3738_v41, %v3340_v17  ;;  %v3327_v38 = vor.u32 %v3734_v31, %v3324_v32  ;;  %v357_v32 = vperm.slane %v4066_v51, 3 }
  0xff   :  { %2173 = vmatpush.bf16.msrb.mxu1 %v3311_v35  ;;  %2160 = vmatpush.bf16.msrb.mxu3 %v3247_v37  ;;  %v3263_v37 = vor.u32 %v3718_v5, %v3260_v24  ;;  %v3426_v24 = vld [vmem:[#allocation8 + $0x1e0] sm:$0xf] }
 0x100   :  { %v3427_v30 = vor.u32 %v3761_v25, %v3426_v24  ;;  %v3754_v24 = vld [vmem:[#allocation8 + $0x1b4] sm:$0xf]  ;;  %v3404_v25 = vld [vmem:[#allocation8 + $0x1b8] sm:$0xf0] }
 0x101   :  { %v1498_v29 = vpop.f32.mrf.mxu3  ;;  %2138 = vmatpush.bf16.msra.mxu2 %v3339_v39 }
 0x102   :  { %v1474_v27 = vpop.f32.mrf.mxu0  ;;  %v1499_v35 = vadd.f32 %v1498_v29, %v1486_v20  ;;  %v3434_v20 = vld [vmem:[#allocation8 + $0x1f0] sm:$0xf] }
 0x103   :  { %2174 = vmatpush.bf16.msrb.mxu1 %v3303_v46  ;;  %2161 = vmatpush.bf16.msrb.mxu3 %v3239_v9  ;;  %v3700_v46 = vld [vmem:[#allocation8 + $0x4] sm:$0xf]  ;;  %v3188_v9 = vld [vmem:[#allocation8 + $0x8] sm:$0xf0]  ;;  %v3435_v5 = vor.u32 %v3763_v21, %v3434_v20  ;;  %v3420_v20 = vld [vmem:[#allocation8 + $0x1d8] sm:$0xf0] }
 0x104   :  { %v3191_v52 = vor.u32 %v3700_v46, %v3188_v9 }
 0x105   :  { %v1487_v48 = vpop.f32.mrf.mxu1  ;;  %2139 = vmatpush.bf16.msra.mxu2 %v3331_v50  ;;  %2147 = vmatpush.bf16.msra.mxu0 %v3435_v5  ;;  %v3412_v5 = vld [vmem:[#allocation8 + $0x1c8] sm:$0xf0] }
 0x106   :  { %v3757_v48 = vld [vmem:[#allocation8 + $0x1c4] sm:$0xf0] }
 0x107   :  { %2175 = vmatpush.bf16.msrb.mxu1 %v3295_v8  ;;  %2162 = vmatpush.bf16.msrb.mxu3 %v3231_v57  ;;  %v1511_v36 = vpop.f32.mrf.mxu2  ;;  %v3323_v57 = vor.u32 %v3735_v3, %v3322_v53  ;;  %v3755_v53 = vld [vmem:[#allocation8 + $0x1b4] sm:$0xf0] }
 0x108   :  { %v1512_v28 = vadd.f32 %v1511_v36, %v1499_v35  ;;  %v3418_v35 = vld [vmem:[#allocation8 + $0x1d0] sm:$0xf]  ;;  %v3759_v36 = vld [vmem:[#allocation8 + $0x1d4] sm:$0xf0] }
 0x109   :  { %v1500_v56 = vpop.f32.mrf.mxu3  ;;  %2140 = vmatpush.bf16.msra.mxu2 %v3323_v57  ;;  %2148 = vmatpush.bf16.msra.mxu0 %v3427_v30  ;;  %v3419_v39 = vor.u32 %v3759_v36, %v3418_v35  ;;  %v3753_v57 = vld [vmem:[#allocation8 + $0x1a4] sm:$0xf0]  ;;  %v3396_v30 = vld [vmem:[#allocation8 + $0x1a8] sm:$0xf0]  ;;  %v3388_v35 = vld [vmem:[#allocation8 + $0x198] sm:$0xf0] }
 0x10a   :  { %v1524_v55 = vpop.f32.mrf.mxu0 }
 0x10b   :  { %2176 = vmatpush.bf16.msrb.mxu1 %v3287_v1  ;;  %2163 = vmatpush.bf16.msrb.mxu3 %v3223_v2  ;;  %v1525_v8 = vadd.f32 %v1524_v55, %v1512_v28  ;;  %v3744_v1 = vld [vmem:[#allocation8 + $0x164] sm:$0xf]  ;;  %v3364_v2 = vld [vmem:[#allocation8 + $0x168] sm:$0xf0]  ;;  %v3410_v28 = vld [vmem:[#allocation8 + $0x1c0] sm:$0xf] }
 0x10c   :  { %v3367_v4 = vor.u32 %v3744_v1, %v3364_v2  ;;  %v3378_v2 = vld [vmem:[#allocation8 + $0x180] sm:$0xf] }
 0x10d   :  { %v1711_v58 = vmax.f32 %v1525_v8, 0.0  ;;  %2141 = vmatpush.bf16.msra.mxu2 %v3315_v62  ;;  %2149 = vmatpush.bf16.msra.mxu0 %v3419_v39  ;;  %v3386_v62 = vld [vmem:[#allocation8 + $0x190] sm:$0xf] }
 0x10f   :  { %2177 = vmatpush.bf16.msrb.mxu1 %v3279_v14  ;;  %2164 = vmatpush.bf16.msrb.mxu3 %v3215_v15  ;;  %v1513_v33 = vpop.f32.mrf.mxu2  ;;  %v1715_v61 = vpack.c.bf16 %v1711_v58, %v1711_v58  ;;  %v3348_v14 = vld [vmem:[#allocation8 + $0x148] sm:$0xf0] }
 0x110   :  { %v3351_v54 = vor.u32 %v3740_v13, %v3348_v14  ;;  %v3394_v33 = vld [vmem:[#allocation8 + $0x1a0] sm:$0xf] }
 0x111   :  { %2129 = vmatmul.bf16.vlgmr.msra.gmra.mxu1 %v1715_v61  ;;  %2186 = vmatpush.bf16.msrb.mxu2 %v3375_v44  ;;  %v3395_v58 = vor.u32 %v3753_v57, %v3394_v33 }
 0x112   :  { %v1526_v63 = vpop.f32.mrf.mxu0 }
 0x113   :  { %2178 = vmatpush.bf16.msrb.mxu1 %v3271_v22  ;;  %2165 = vmatpush.bf16.msrb.mxu3 %v3207_v23  ;;  %v3736_v22 = vld [vmem:[#allocation8 + $0x124] sm:$0xf]  ;;  %v3332_v23 = vld [vmem:[#allocation8 + $0x128] sm:$0xf0]  ;;  %v3751_v63 = vld [vmem:[#allocation8 + $0x194] sm:$0xf0] }
 0x114   :  { %v3335_v26 = vor.u32 %v3736_v22, %v3332_v23  ;;  %v3387_v40 = vor.u32 %v3751_v63, %v3386_v62  ;;  %v3756_v22 = vld [vmem:[#allocation8 + $0x1c4] sm:$0xf] }
 0x115   :  { %2187 = vmatpush.bf16.msrb.mxu2 %v3367_v4  ;;  %v3749_v4 = vld [vmem:[#allocation8 + $0x184] sm:$0xf0]  ;;  %v3415_v23 = vor.u32 %v3756_v22, %v3412_v5  ;;  %v3775_v22 = vld [vmem:[#allocation10 + $0x58] sm:$0xff] }
 0x116   :  { %v3379_v10 = vor.u32 %v3749_v4, %v3378_v2 }
 0x117   :  { %2179 = vmatpush.bf16.msrb.mxu1 %v3263_v37  ;;  %2166 = vmatpush.bf16.msrb.mxu3 %v3199_v42  ;;  %v3732_v42 = vld [vmem:[#allocation8 + $0x104] sm:$0xf] }
 0x118   :  { %v3319_v18 = vor.u32 %v3732_v42, %v3316_v43 }
 0x119   :  { %2188 = vmatpush.bf16.msrb.mxu2 %v3359_v11  ;;  %v3762_v11 = vld [vmem:[#allocation8 + $0x1f4] sm:$0xf] }
 0x11b   :  { %2180 = vmatpush.bf16.msrb.mxu1 %v3255_v49  ;;  %2167 = vmatpush.bf16.msrb.mxu3 %v3191_v52  ;;  %v1537_v6 = vpop.f32.mrf.mxu1  ;;  %v3411_v49 = vor.u32 %v3757_v48, %v3410_v28  ;;  %v3402_v52 = vld [vmem:[#allocation8 + $0x1b0] sm:$0xf] }
 0x11c   :  { %v1538_v45 = vadd.f32 %v1537_v6, %v356_v34  ;;  %v3403_v55 = vor.u32 %v3755_v53, %v3402_v52  ;;  %v3750_v34 = vld [vmem:[#allocation8 + $0x194] sm:$0xf] }
 0x11d   :  { %2189 = vmatpush.bf16.msrb.mxu2 %v3351_v54  ;;  %2150 = vmatpush.bf16.msra.mxu0 %v3411_v49  ;;  %v3428_v54 = vld [vmem:[#allocation8 + $0x1e8] sm:$0xf0]  ;;  %v3391_v36 = vor.u32 %v3750_v34, %v3388_v35 }
 0x11e   :  { %2168 = vmatmul.bf16.vlgmr.msrb.gmra.mxu3 %v4082_v47 }
 0x121   :  { %v1550_v47 = vpop.f32.mrf.mxu3  ;;  %2181 = vmatmul.bf16.vlgmr.msrb.gmra.mxu1 %v1715_v61  ;;  %2190 = vmatpush.bf16.msrb.mxu2 %v3343_v19  ;;  %v3758_v19 = vld [vmem:[#allocation8 + $0x1d4] sm:$0xf] }
 0x122   :  { %v1563_v12 = vpop.f32.mrf.mxu0  ;;  %v1551_v9 = vadd.f32 %v1550_v47, %v1538_v45  ;;  %2151 = vmatpush.bf16.msra.mxu0 %v3403_v55  ;;  %v3423_v21 = vor.u32 %v3758_v19, %v3420_v20  ;;  %v3748_v45 = vld [vmem:[#allocation8 + $0x184] sm:$0xf] }
 0x123   :  { %v1539_v15 = vpop.f32.mrf.mxu1  ;;  %v3764_v20 = vld [vmem:[#allocation10] sm:$0xff] }
 0x124   :  { %v1564_v50 = vadd.f32 %v1563_v12, %v1551_v9  ;;  %v3436_v12 = vld [vmem:[#allocation8 + $0x1f8] sm:$0xf0]  ;;  %v3760_v15 = vld [vmem:[#allocation8 + $0x1e4] sm:$0xf] }
 0x125   :  { %2191 = vmatpush.bf16.msrb.mxu2 %v3335_v26  ;;  %v3439_v13 = vor.u32 %v3762_v11, %v3436_v12  ;;  %v3770_v11 = vld [vmem:[#allocation10 + $0x30] sm:$0xff]  ;;  %v3769_v12 = vld [vmem:[#allocation10 + $0x28] sm:$0xff] }
 0x126   :  { %2152 = vmatpush.bf16.msra.mxu0 %v3395_v58 }
 0x127   :  { %v1576_v16 = vpop.f32.mrf.mxu2 }
 0x128   :  { %v1577_v8 = vadd.f32 %v1576_v16, %v1564_v50  ;;  %v3431_v16 = vor.u32 %v3760_v15, %v3428_v54  ;;  %v3767_v15 = vld [vmem:[#allocation10 + $0x18] sm:$0xff] }
 0x129   :  { %v1552_v29 = vpop.f32.mrf.mxu3  ;;  %2192 = vmatpush.bf16.msrb.mxu2 %v3327_v38 }
 0x12a   :  { %v1565_v27 = vpop.f32.mrf.mxu0  ;;  %2153 = vmatpush.bf16.msra.mxu0 %v3387_v40  ;;  %v3752_v29 = vld [vmem:[#allocation8 + $0x1a4] sm:$0xf] }
 0x12b   :  { %v3407_v27 = vor.u32 %v3754_v24, %v3404_v25  ;;  %v3399_v31 = vor.u32 %v3752_v29, %v3396_v30  ;;  %v3773_v24 = vld [vmem:[#allocation10 + $0x48] sm:$0xff] }
 0x12d   :  { %2193 = vmatpush.bf16.msrb.mxu2 %v3319_v18  ;;  %v3380_v18 = vld [vmem:[#allocation8 + $0x188] sm:$0xf0] }
 0x12e   :  { %2154 = vmatpush.bf16.msra.mxu0 %v3379_v10  ;;  %v3771_v10 = vld [vmem:[#allocation10 + $0x38] sm:$0xff] }
 0x12f   :  { %v1578_v37 = vpop.f32.mrf.mxu2  ;;  %2348 = vmatpush.bf16.msra.mxu3 %v3771_v10 }
 0x132   :  { %v1615_v46 = vpop.f32.mrf.mxu0  ;;  %2199 = vmatpush.bf16.msrb.mxu0 %v3439_v13  ;;  %v3768_v13 = vld [vmem:[#allocation10 + $0x20] sm:$0xff] }
 0x133   :  { %2349 = vmatpush.bf16.msra.mxu3 %v3770_v11 }
 0x136   :  { %2200 = vmatpush.bf16.msrb.mxu0 %v3431_v16  ;;  %v3766_v16 = vld [vmem:[#allocation10 + $0x10] sm:$0xff] }
 0x137   :  { %2350 = vmatpush.bf16.msra.mxu3 %v3769_v12 }
 0x13a   :  { %v1617_v56 = vpop.f32.mrf.mxu0  ;;  %2201 = vmatpush.bf16.msrb.mxu0 %v3423_v21  ;;  %v3776_v21 = vld [vmem:[#allocation10 + $0x60] sm:$0xff] }
 0x13b   :  { %v1589_v3 = vpop.f32.mrf.mxu1  ;;  %2351 = vmatpush.bf16.msra.mxu3 %v3768_v13 }
 0x13c   :  { %v1590_v59 = vadd.f32 %v1589_v3, %v1577_v8 }
 0x13e   :  { %2202 = vmatpush.bf16.msrb.mxu0 %v3415_v23  ;;  %v3774_v23 = vld [vmem:[#allocation10 + $0x50] sm:$0xff] }
 0x13f   :  { %2352 = vmatpush.bf16.msra.mxu3 %v3767_v15 }
 0x141   :  { %v1602_v60 = vpop.f32.mrf.mxu3 }
 0x142   :  { %v1603_v61 = vadd.f32 %v1602_v60, %v1590_v59  ;;  %2203 = vmatpush.bf16.msrb.mxu0 %v3407_v27  ;;  %v1782_v59 = vld [vmem:[%s4101_s4] sm:$0x3] }
 0x143   :  { %v1591_v0 = vpop.f32.mrf.mxu1  ;;  %v1784_v60 = vperm.slane %v1782_v59, 0  ;;  %2353 = vmatpush.bf16.msra.mxu3 %v3766_v16 }
 0x144   :  { %v1616_v44 = vadd.f32 %v1615_v46, %v1603_v61  ;;  %v3383_v46 = vor.u32 %v3748_v45, %v3380_v18  ;;  %v3796_v45 = vld [vmem:[%s4103_s6] ss:$0 sm:$0xff] }
 0x146   :  { %v1712_v6 = vmax.f32 %v1616_v44, 0.0  ;;  %v1641_v7 = vpop.f32.mrf.mxu0  ;;  %2204 = vmatpush.bf16.msrb.mxu0 %v3399_v31  ;;  %v1785_v44 = vperm.slane %v1782_v59, 1 }
 0x147   :  { %v1628_v1 = vpop.f32.mrf.mxu2 }
 0x148   :  { %v1716_v47 = vpack.c.bf16 %v1712_v6, %v1712_v6  ;;  %v1629_v39 = vadd.f32 %v1628_v1, %v357_v32 }
 0x149   :  { %v1604_v14 = vpop.f32.mrf.mxu3 }
 0x14a   :  { %2142 = vmatmul.bf16.vlgmr.msra.gmra.mxu2 %v1716_v47  ;;  %2205 = vmatpush.bf16.msrb.mxu0 %v3391_v36  ;;  %v1642_v9 = vadd.f32 %v1641_v7, %v1629_v39  ;;  %v3778_v14 = vld [vmem:[#allocation10 + $0x70] sm:$0xff] }
 0x14e   :  { %v1643_v17 = vpop.f32.mrf.mxu0  ;;  %2206 = vmatpush.bf16.msrb.mxu0 %v3383_v46 }
 0x14f   :  { %v1630_v41 = vpop.f32.mrf.mxu2  ;;  %v3777_v17 = vld [vmem:[#allocation10 + $0x68] sm:$0xff] }
 0x150   :  { %v3765_v41 = vld [vmem:[#allocation10 + $0x8] sm:$0xff] }
 0x151   :  { %2354 = vmatpush.bf16.msra.mxu3 %v3765_v41 }
 0x155   :  { %2355 = vmatpush.bf16.msra.mxu3 %v3764_v20 }
 0x15a   :  { %2194 = vmatmul.bf16.vlgmr.msrb.gmra.mxu2 %v1716_v47  ;;  %v3779_v47 = vld [vmem:[#allocation10 + $0x78] sm:$0xff] }
 0x15b   :  { %v1654_v26 = vpop.f32.mrf.mxu1  ;;  %2361 = vmatpush.bf16.msra.mxu1 %v3779_v47 }
 0x15c   :  { %v1655_v28 = vadd.f32 %v1654_v26, %v1642_v9  ;;  %v3772_v26 = vld [vmem:[#allocation10 + $0x40] sm:$0xff] }
 0x15f   :  { %2362 = vmatpush.bf16.msra.mxu1 %v3778_v14 }
 0x161   :  { %v1667_v37 = vpop.f32.mrf.mxu3 }
 0x162   :  { %v1668_v49 = vadd.f32 %v1667_v37, %v1655_v28 }
 0x163   :  { %v1656_v38 = vpop.f32.mrf.mxu1  ;;  %2363 = vmatpush.bf16.msra.mxu1 %v3777_v17 }
 0x165   :  { %v1693_v43 = vpop.f32.mrf.mxu0 }
 0x167   :  { %v1680_v42 = vpop.f32.mrf.mxu2  ;;  %2364 = vmatpush.bf16.msra.mxu1 %v3776_v21 }
 0x168   :  { %v1681_v52 = vadd.f32 %v1680_v42, %v1668_v49 }
 0x169   :  { %v1669_v48 = vpop.f32.mrf.mxu3 }
 0x16a   :  { %v1694_v53 = vadd.f32 %v1693_v43, %v1681_v52 }
 0x16b   :  { %2365 = vmatpush.bf16.msra.mxu1 %v3775_v22 }
 0x16d   :  { %v1695_v51 = vpop.f32.mrf.mxu0 }
 0x16f   :  { %v1682_v50 = vpop.f32.mrf.mxu2  ;;  %2366 = vmatpush.bf16.msra.mxu1 %v3774_v23 }
 0x173   :  { %2367 = vmatpush.bf16.msra.mxu1 %v3773_v24 }
 0x177   :  { %v1706_v3 = vpop.f32.mrf.mxu2  ;;  %2368 = vmatpush.bf16.msra.mxu1 %v3772_v26 }
 0x178   :  { %v1707_v55 = vadd.f32 %v1706_v3, %v1694_v53 }
 0x17a   :  { %v1713_v56 = vmax.f32 %v1707_v55, 0.0 }
 0x17c   :  { %v1717_v8 = vpack.c.bf16 %v1713_v56, %v1713_v56 }
 0x17e   :  { %2155 = vmatmul.bf16.vlgmr.msra.gmra.mxu0 %v1717_v8 }
 0x17f   :  { %v1708_v33 = vpop.f32.mrf.mxu2 }
 0x181   :  { %v2117_v57 = vpop.f32.mrf.mxu3 }
 0x182   :  { %v2118_v61 = vadd.f32 %v2117_v57, %v1784_v60 }
 0x189   :  { %v2119_v58 = vpop.f32.mrf.mxu3 }
 0x18e   :  { %2207 = vmatmul.bf16.vlgmr.msrb.gmra.mxu0 %v1717_v8  ;;  %v2130_v62 = vpop.f32.mrf.mxu1 }
 0x18f   :  { %v2131_v63 = vadd.f32 %v2130_v62, %v2118_v61 }
 0x196   :  { %v2132_v40 = vpop.f32.mrf.mxu1 }
 0x19e   :  { %v2182_v4 = vpop.f32.mrf.mxu1 }
 0x1a1   :  { %v2169_v0 = vpop.f32.mrf.mxu3 }
 0x1a2   :  { %v2170_v2 = vadd.f32 %v2169_v0, %v1785_v44 }
 0x1a4   :  { %v2183_v6 = vadd.f32 %v2182_v4, %v2170_v2 }
 0x1a6   :  { %v2184_v7 = vpop.f32.mrf.mxu1 }
 0x1a9   :  { %v2171_v1 = vpop.f32.mrf.mxu3 }
 0x1cd   :  { %v2143_v54 = vpop.f32.mrf.mxu2 }
 0x1ce   :  { %v2144_v27 = vadd.f32 %v2143_v54, %v2131_v63 }
 0x1d5   :  { %v2145_v19 = vpop.f32.mrf.mxu2 }
 0x1dd   :  { %v2195_v5 = vpop.f32.mrf.mxu2 }
 0x1de   :  { %v2196_v35 = vadd.f32 %v2195_v5, %v2183_v6 }
 0x1e5   :  { %v2197_v25 = vpop.f32.mrf.mxu2 }
 0x1fb   :  { %v2156_v29 = vpop.f32.mrf.mxu0 }
 0x1fc   :  { %v2157_v30 = vadd.f32 %v2156_v29, %v2144_v27 }
 0x1fe   :  { %v2212_v31 = vmax.f32 %v2157_v30, 0.0 }
 0x200   :  { %v2214_v32 = vpack.c.bf16 %v2212_v31, %v2212_v31 }
 0x202   :  { %2356 = vmatmul.bf16.vlgmr.msra.gmra.mxu3 %v2214_v32 }
 0x203   :  { %v2158_v34 = vpop.f32.mrf.mxu0 }
 0x20b   :  { %v2208_v36 = vpop.f32.mrf.mxu0 }
 0x20c   :  { %v2209_v37 = vadd.f32 %v2208_v36, %v2196_v35 }
 0x20e   :  { %v2213_v38 = vmax.f32 %v2209_v37, 0.0 }
 0x210   :  { %v2215_v39 = vpack.c.bf16 %v2213_v38, %v2213_v38 }
 0x212   :  { %2369 = vmatmul.bf16.vlgmr.msra.gmra.mxu1 %v2215_v39 }
 0x213   :  { %v2210_v42 = vpop.f32.mrf.mxu0 }
 0x285   :  { %v2357_v43 = vpop.f32.mrf.mxu3 }
 0x286   :  { %v2358_v46 = vadd.f32 %v3796_v45, %v2357_v43 }
 0x28d   :  { %v2359_v18 = vpop.f32.mrf.mxu3 }
 0x28f   :  { %v2370_v9 = vpop.f32.mrf.mxu1 }
 0x290   :  { %v2371_v28 = vadd.f32 %v2370_v9, %v2358_v46 }
 0x292   :  { %2374 = vst [vmem:[#allocation11] sm:$0xff] %v2371_v28 }
 0x297   :  { %v2372_v48 = vpop.f32.mrf.mxu1 }
 0x298   :  { %2378 = vsyncadd [#allocation4], 96  ;;  %s2381_s11 = sshll.u32 %s4104_s7, 4  ;;  %s3962_s12 = smov [#allocation11]   ;;  %s2382_s11 = int_to_ptr.hbm [resolvable:$true] %s2381_s11 }
 0x299   :  { %s2379_s13 = sshll.u32 %s3962_s12, 4  ;;  %s3963_s14 = smov 32   ;;  %s2380_s13 = int_to_ptr.vmem [resolvable:$true] %s2379_s13 }
 0x29a   :  { %s3964_s1 = smov 2  }
 0x29b   :  { %2387 = dma.vmem_to_hbm [thread:$0]  %s2380_s13, 32, %s2382_s11, [#allocation4], %s3963_s14, %s3963_s14, %s3964_s1  }
 0x29c   :  { %3947 = dma.done.wait [#allocation4], 128  }
 0x29d   :  { %3948 = vsyncadd [#allocation4], 4294967168 }
 0x29e   :  { %2392 = vsyncpa [#allocation3], 1 }
 0x29f   :  { %2393 = vsyncpa [#allocation6], 1 }
 0x2a0   :  { %2394 = vsyncpa [#allocation9], 1 }
 0x2a1   :  { %2395 = vsyncpa [#allocation4], 1 }

</bundles_post_ra>
